<compile_context>
chip_gen: v7x
topology: tpu7x:2x2x1
jax: 0.10.0
libtpu: 0.0.40
codegen_flags: <defaults>
</compile_context>

<pallas_src>
import jax
import jax.numpy as jnp
from jax.experimental import pallas as pl
from jax.experimental.pallas import tpu as pltpu


# ----------------------------------------------------------------------------
# Parameter construction (deterministic, synthetic, raw f32 — used by reference).
# ----------------------------------------------------------------------------
def init_params(key, user_num, item_num, item_emb_size=32, item_mem_num=8,
                user_emb_size=32, mem_size=128, hidden_size=128):
  q = item_emb_size // 4
  keys = jax.random.split(key, 32)
  k = iter(range(32))

  def lin(kw, kb, fan_in, fan_out):
    scale = 1.0 / jnp.sqrt(jnp.float32(fan_in))
    w = jax.random.uniform(keys[kw], (fan_in, fan_out), jnp.float32, -scale, scale)
    b = jax.random.uniform(keys[kb], (1, fan_out), jnp.float32, -scale, scale)
    return w, b

  params = {}
  params["user_embedding"] = jax.random.normal(
      keys[next(k)], (user_num, user_emb_size), jnp.float32)
  std = jnp.sqrt(2.0 / (user_emb_size + mem_size))      # xavier-normal-ish memory
  params["memory"] = std * jax.random.normal(
      keys[next(k)], (user_emb_size, mem_size), jnp.float32)

  params["wh1"], params["bh1"] = lin(next(k), next(k), mem_size, hidden_size)
  params["ww1"], params["bw1"] = lin(next(k), next(k), hidden_size, item_emb_size * q)
  params["wb1"], params["bb1"] = lin(next(k), next(k), hidden_size, q)

  params["wh2"], params["bh2"] = lin(next(k), next(k), mem_size, hidden_size)
  params["ww2"], params["bw2"] = lin(next(k), next(k), hidden_size, q * 1)
  params["wb2"], params["bb2"] = lin(next(k), next(k), hidden_size, 1)

  params["wh3"], params["bh3"] = lin(next(k), next(k), mem_size, hidden_size)
  params["we1"], params["be1"] = lin(next(k), next(k), hidden_size, item_num * item_mem_num)
  params["we2"], params["be2"] = lin(next(k), next(k), hidden_size, item_mem_num * item_emb_size)

  meta = dict(item_num=item_num, item_emb_size=item_emb_size,
              item_mem_num=item_mem_num, user_emb_size=user_emb_size,
              mem_size=mem_size, hidden_size=hidden_size)
  return params, meta


# ----------------------------------------------------------------------------
# One-time host-side packing (precomposition, permutation, padding, bf16 cast).
# ----------------------------------------------------------------------------
def pack_params(params, meta):
  bf16 = jnp.bfloat16
  hidden = meta["hidden_size"]
  item_num = meta["item_num"]
  mnum = meta["item_mem_num"]
  emb = meta["item_emb_size"]

  # Shared hidden matmul for the three branches, precomposed with the memory:
  # hid = relu(ue @ (memory @ [wh1|wh2|wh3]) + bh).  Composed in f32, cast once.
  wh = jnp.concatenate([params["wh1"], params["wh2"], params["wh3"]], axis=1)
  whf = params["memory"] @ wh                                    # (user_emb, 3H) f32
  bh = jnp.concatenate([params["bh1"], params["bh2"], params["bh3"]], axis=1)

  # Heads 1 & 2, block-diagonal, zero-padded to a 128-multiple of output columns
  # so the kernel's small-output stores are full-vreg / unmasked.
  h1 = jnp.concatenate([params["ww1"], params["wb1"]], axis=1)   # (H, emb*q + q)
  h2 = jnp.concatenate([params["ww2"], params["wb2"]], axis=1)   # (H, q + 1)
  n1, n2 = h1.shape[1], h2.shape[1]
  n12 = n1 + n2
  n12_pad = ((n12 + 127) // 128) * 128
  w12 = jnp.zeros((2 * hidden, n12_pad), jnp.float32)
  w12 = w12.at[:hidden, :n1].set(h1)
  w12 = w12.at[hidden:, n1:n12].set(h2)
  b12 = jnp.concatenate(
      [params["bw1"], params["bb1"], params["bw2"], params["bb2"],
       jnp.zeros((1, n12_pad - n12), jnp.float32)], axis=1)      # (1, n12_pad)

  # Head 3: permute we1's columns so the emb_left slab reshapes in-kernel to
  # (B, item_mem_num, item_num) (dense lanes) instead of (B, item_num, 8).
  we1_p = params["we1"].reshape(hidden, item_num, mnum).transpose(0, 2, 1)
  we1_p = we1_p.reshape(hidden, mnum * item_num)
  be1_p = params["be1"].reshape(1, item_num, mnum).transpose(0, 2, 1)
  be1_p = be1_p.reshape(1, mnum * item_num)
  w3 = jnp.concatenate([we1_p, params["we2"]], axis=1)           # (H, m*N + m*emb)
  b3 = jnp.concatenate([be1_p, params["be2"]], axis=1)

  # Single merged f32 bias row (one DMA): [bh | b12 | b3].
  b_all = jnp.concatenate([bh, b12, b3], axis=1)

  return {
      "user_embedding": params["user_embedding"],                # f32 gather table
      "memory": params["memory"].astype(bf16),
      "whf": whf.astype(bf16),
      "w12": w12.astype(bf16),
      "w3": w3.astype(bf16),
      "b_all": b_all,                                            # f32 biases
  }


# ----------------------------------------------------------------------------
# Forward pass: single fused pallas_call, no grid (everything fits in VMEM).
# ----------------------------------------------------------------------------
def meta_recommender_forward(packed, meta, user_id):
  item_num = meta["item_num"]
  emb = meta["item_emb_size"]
  mnum = meta["item_mem_num"]
  mem = meta["mem_size"]
  hidden = meta["hidden_size"]
  q = emb // 4

  th = 3 * hidden
  n12 = emb * q + q + q + 1
  n12_pad = ((n12 + 127) // 128) * 128
  nel = item_num * mnum
  small_w = mem + n12_pad

  # Pad batch to a multiple of 8 so f32 sublane tiles / MXU pushes are full.
  B = user_id.shape[0]
  Bp = ((B + 7) // 8) * 8
  user_id_p = jnp.pad(user_id, (0, Bp - B)) if Bp != B else user_id

  # TODO(synk): the embedding gather stays plain-JAX glue; an in-kernel
  # scalar-prefetch gather is possible but not worth the lowering risk here.
  ue = packed["user_embedding"][user_id_p].astype(jnp.bfloat16)  # (Bp, user_emb)

  def kernel(ue_ref, mem_ref, whf_ref, w12_ref, w3_ref, b_ref, small_ref, item_ref):
    f32, bf16 = jnp.float32, jnp.bfloat16
    ue_v = ue_ref[...]
    # Critical path: hidden matmul depends only on ue (memory @ wh precomposed).
    hid = jnp.dot(ue_v, whf_ref[...], preferred_element_type=f32) + b_ref[:, 0:th]
    hid = jnp.maximum(hid, 0.0).astype(bf16)                     # (Bp, 3H)
    # cf_vec is output-only now; runs in parallel with the chain above.
    cf = jnp.dot(ue_v, mem_ref[...], preferred_element_type=f32)  # (Bp, mem)
    # Heads 1+2 (block-diagonal, padded to n12_pad lanes): [w1 | b1 | w2 | b2 | 0].
    out12 = jnp.dot(hid[:, :2 * hidden], w12_ref[...],
                    preferred_element_type=f32) + b_ref[:, th:th + n12_pad]
    # Head 3: [emb_left (column-permuted) | emb_right].
    out3 = jnp.dot(hid[:, 2 * hidden:], w3_ref[...],
                   preferred_element_type=f32) + b_ref[:, th + n12_pad:]
    el_t = out3[:, :nel].reshape(Bp, mnum, item_num)             # (Bp, 8, N)
    er = out3[:, nel:].reshape(Bp, mnum, emb)                    # (Bp, 8, emb)
    # Fused per-user bmm, contracting the sublane axis m=8 (transposed-LHS MXU).
    item_ref[...] = jnp.einsum("bmn,bmd->bnd", el_t, er,
                               preferred_element_type=f32)
    # Packed small output: two 128-aligned, unmasked slice stores.
    small_ref[:, :mem] = cf
    small_ref[:, mem:] = out12

  # TODO(synk): when item_num scales up, tile head 3 + the bmm over an item_num
  # grid axis ("parallel": v7x 2nd TC + VMEM budget) and emit item_embedding
  # lane-dense; at item_num=64 the (Bp, 64, 32) store is 16 KiB and not worth
  # the in-kernel minor-dim-merge relayout a flat (Bp, 2048) output would need.
  vmem = pl.BlockSpec(memory_space=pltpu.MemorySpace.VMEM)
  small, item = pl.pallas_call(
      kernel,
      out_shape=(jax.ShapeDtypeStruct((Bp, small_w), jnp.float32),
                 jax.ShapeDtypeStruct((Bp, item_num, emb), jnp.float32)),
      in_specs=[vmem] * 6,
      out_specs=(vmem, vmem),
  )(ue, packed["memory"], packed["whf"], packed["w12"], packed["w3"],
    packed["b_all"])

  # Unpack (plain-JAX slices/reshapes matching torch .view semantics).
  cf_vec = small[:B, :mem]
  off = mem
  weight1 = small[:B, off:off + emb * q].reshape(B, emb, q); off += emb * q
  bias1 = small[:B, off:off + q].reshape(B, 1, q); off += q
  weight2 = small[:B, off:off + q].reshape(B, q, 1); off += q
  bias2 = small[:B, off:off + 1].reshape(B, 1, 1)
  item_embedding = item[:B]
  return [weight1, weight2], [bias1, bias2], item_embedding, cf_vec


# ----------------------------------------------------------------------------
# Pure-JAX reference (mirrors the PyTorch forward exactly, f32 throughout).
# ----------------------------------------------------------------------------
def meta_recommender_ref(params, meta, user_id):
  item_num = meta["item_num"]
  item_emb_size = meta["item_emb_size"]
  item_mem_num = meta["item_mem_num"]
  q = item_emb_size // 4

  user_emb = params["user_embedding"][user_id]
  cf_vec = user_emb @ params["memory"]
  B = cf_vec.shape[0]

  def one_layer(wh, bh, ww, bw, wb, bb, int_size, out_size):
    hid = jax.nn.relu(cf_vec @ wh + bh)
    w = (hid @ ww + bw).reshape(B, int_size, out_size)
    b = (hid @ wb + bb).reshape(B, 1, out_size)
    return w, b

  w1, b1 = one_layer(params["wh1"], params["bh1"], params["ww1"], params["bw1"],
                     params["wb1"], params["bb1"], item_emb_size, q)
  w2, b2 = one_layer(params["wh2"], params["bh2"], params["ww2"], params["bw2"],
                     params["wb2"], params["bb2"], q, 1)

  hid3 = jax.nn.relu(cf_vec @ params["wh3"] + params["bh3"])
  el = (hid3 @ params["we1"] + params["be1"]).reshape(B, item_num, item_mem_num)
  er = (hid3 @ params["we2"] + params["be2"]).reshape(B, item_mem_num, item_emb_size)
  item_embedding = jnp.einsum("bnm,bmd->bnd", el, er)
  return [w1, w2], [b1, b2], item_embedding, cf_vec


if __name__ == "__main__":
  key = jax.random.PRNGKey(0)
  pkey, ikey = jax.random.split(key)

  USER_NUM, ITEM_NUM = 16, 64
  params, meta = init_params(
      pkey, USER_NUM, ITEM_NUM,
      item_emb_size=32, item_mem_num=8, user_emb_size=32,
      mem_size=128, hidden_size=128)
  packed = pack_params(params, meta)

  user_id = jax.random.randint(ikey, (2,), 0, USER_NUM)   # batch = 2

  weights, biases, item_embedding, cf_vec = jax.block_until_ready(
      meta_recommender_forward(packed, meta, user_id))

  # sanity: shapes + numerics vs pure-JAX f32 reference (bf16 MXU, f32 accum)
  rw, rb, r_item_emb, r_cf = meta_recommender_ref(params, meta, user_id)
  assert weights[0].shape == (2, 32, 8) and weights[1].shape == (2, 8, 1)
  assert biases[0].shape == (2, 1, 8) and biases[1].shape == (2, 1, 1)
  assert item_embedding.shape == (2, ITEM_NUM, 32) and cf_vec.shape == (2, 128)
  for got, exp in [(weights[0], rw[0]), (weights[1], rw[1]),
                   (biases[0], rb[0]), (biases[1], rb[1]),
                   (item_embedding, r_item_emb), (cf_vec, r_cf)]:
    assert jnp.allclose(got, exp, rtol=2e-2, atol=2e-2), "mismatch vs reference"

  print("KERNEL_OK")
</pallas_src>

<mosaic_0001>
module attributes {stable_mosaic.version = 11 : i64} {
  func.func @kernel(%arg0: memref<8x32xbf16, #tpu.memory_space<vmem>>, %arg1: memref<32x128xbf16, #tpu.memory_space<vmem>>, %arg2: memref<32x384xbf16, #tpu.memory_space<vmem>>, %arg3: memref<256x384xbf16, #tpu.memory_space<vmem>>, %arg4: memref<128x768xbf16, #tpu.memory_space<vmem>>, %arg5: memref<1x1536xf32, #tpu.memory_space<vmem>>, %arg6: memref<8x512xf32, #tpu.memory_space<vmem>>, %arg7: memref<8x64x32xf32, #tpu.memory_space<vmem>>) attributes {dimension_semantics = [], scalar_prefetch = 0 : i64, scratch_operands = 0 : i64, tpu.core_type = #tpu.core_type<tc>} {
    %c0 = arith.constant 0 : index
    %c0_0 = arith.constant 0 : index
    %0 = vector.load %arg0[%c0, %c0_0] : memref<8x32xbf16, #tpu.memory_space<vmem>>, vector<8x32xbf16>
    %c0_1 = arith.constant 0 : index
    %c0_2 = arith.constant 0 : index
    %1 = vector.load %arg2[%c0_1, %c0_2] : memref<32x384xbf16, #tpu.memory_space<vmem>>, vector<32x384xbf16>
    %cst = arith.constant dense<0.000000e+00> : vector<8x384xf32>
    %2 = tpu.matmul %0, %1, %cst {dimension_numbers = #tpu.dot_dimension_numbers<[1], [0], [0], [1], [0, 0, 1, 1], [], []>} : vector<8x32xbf16>, vector<32x384xbf16>, vector<8x384xf32> -> vector<8x384xf32>
    %c0_3 = arith.constant 0 : index
    %c0_4 = arith.constant 0 : index
    %3 = vector.load %arg5[%c0_3, %c0_4] : memref<1x1536xf32, #tpu.memory_space<vmem>>, vector<1x384xf32>
    %4 = vector.broadcast %3 : vector<1x384xf32> to vector<8x384xf32>
    %5 = arith.addf %2, %4 : vector<8x384xf32>
    %cst_5 = arith.constant 0.000000e+00 : f32
    %6 = vector.broadcast %cst_5 : f32 to vector<8x384xf32>
    %7 = arith.maximumf %5, %6 : vector<8x384xf32>
    %8 = arith.truncf %7 : vector<8x384xf32> to vector<8x384xbf16>
    %c0_6 = arith.constant 0 : index
    %c0_7 = arith.constant 0 : index
    %9 = vector.load %arg1[%c0_6, %c0_7] : memref<32x128xbf16, #tpu.memory_space<vmem>>, vector<32x128xbf16>
    %cst_8 = arith.constant dense<0.000000e+00> : vector<8x128xf32>
    %10 = tpu.matmul %0, %9, %cst_8 {dimension_numbers = #tpu.dot_dimension_numbers<[1], [0], [0], [1], [0, 0, 1, 1], [], []>} : vector<8x32xbf16>, vector<32x128xbf16>, vector<8x128xf32> -> vector<8x128xf32>
    %11 = vector.extract_strided_slice %8 {offsets = [0, 0], sizes = [8, 256], strides = [1, 1]} : vector<8x384xbf16> to vector<8x256xbf16>
    %c0_9 = arith.constant 0 : index
    %c0_10 = arith.constant 0 : index
    %12 = vector.load %arg3[%c0_9, %c0_10] : memref<256x384xbf16, #tpu.memory_space<vmem>>, vector<256x384xbf16>
    %cst_11 = arith.constant dense<0.000000e+00> : vector<8x384xf32>
    %13 = tpu.matmul %11, %12, %cst_11 {dimension_numbers = #tpu.dot_dimension_numbers<[1], [0], [0], [1], [0, 0, 1, 1], [], []>} : vector<8x256xbf16>, vector<256x384xbf16>, vector<8x384xf32> -> vector<8x384xf32>
    %c0_12 = arith.constant 0 : index
    %c384 = arith.constant 384 : index
    %14 = vector.load %arg5[%c0_12, %c384] : memref<1x1536xf32, #tpu.memory_space<vmem>>, vector<1x384xf32>
    %15 = vector.broadcast %14 : vector<1x384xf32> to vector<8x384xf32>
    %16 = arith.addf %13, %15 : vector<8x384xf32>
    %17 = vector.extract_strided_slice %8 {offsets = [0, 256], sizes = [8, 128], strides = [1, 1]} : vector<8x384xbf16> to vector<8x128xbf16>
    %c0_13 = arith.constant 0 : index
    %c0_14 = arith.constant 0 : index
    %18 = vector.load %arg4[%c0_13, %c0_14] : memref<128x768xbf16, #tpu.memory_space<vmem>>, vector<128x768xbf16>
    %cst_15 = arith.constant dense<0.000000e+00> : vector<8x768xf32>
    %19 = tpu.matmul %17, %18, %cst_15 {dimension_numbers = #tpu.dot_dimension_numbers<[1], [0], [0], [1], [0, 0, 1, 1], [], []>} : vector<8x128xbf16>, vector<128x768xbf16>, vector<8x768xf32> -> vector<8x768xf32>
    %c0_16 = arith.constant 0 : index
    %c768 = arith.constant 768 : index
    %20 = vector.load %arg5[%c0_16, %c768] : memref<1x1536xf32, #tpu.memory_space<vmem>>, vector<1x768xf32>
    %21 = vector.broadcast %20 : vector<1x768xf32> to vector<8x768xf32>
    %22 = arith.addf %19, %21 : vector<8x768xf32>
    %23 = vector.extract_strided_slice %22 {offsets = [0, 0], sizes = [8, 512], strides = [1, 1]} : vector<8x768xf32> to vector<8x512xf32>
    %24 = vector.shape_cast %23 : vector<8x512xf32> to vector<8x8x64xf32>
    %25 = vector.extract_strided_slice %22 {offsets = [0, 512], sizes = [8, 256], strides = [1, 1]} : vector<8x768xf32> to vector<8x256xf32>
    %26 = vector.shape_cast %25 : vector<8x256xf32> to vector<8x8x32xf32>
    "tpu.trace_start"() <{level = 10 : i32, message = "bmn,bmd->bnd"}> : () -> ()
    %cst_17 = arith.constant dense<0.000000e+00> : vector<8x64x32xf32>
    %27 = tpu.matmul %24, %26, %cst_17 {dimension_numbers = #tpu.dot_dimension_numbers<[1], [1], [2], [2], [0, 0, 0, 2, 1, 2], [0], [0]>} : vector<8x8x64xf32>, vector<8x8x32xf32>, vector<8x64x32xf32> -> vector<8x64x32xf32>
    "tpu.trace_stop"() : () -> ()
    %c0_18 = arith.constant 0 : index
    %c0_19 = arith.constant 0 : index
    %c0_20 = arith.constant 0 : index
    %28 = vector.load %arg7[%c0_18, %c0_19, %c0_20] : memref<8x64x32xf32, #tpu.memory_space<vmem>>, vector<8x64x32xf32>
    tpu.vector_store %arg7[%c0_18, %c0_19, %c0_20], %27 {strides = array<i32>} : memref<8x64x32xf32, #tpu.memory_space<vmem>>, vector<8x64x32xf32>,
    %c0_21 = arith.constant 0 : index
    %c0_22 = arith.constant 0 : index
    %29 = vector.load %arg6[%c0_21, %c0_22] : memref<8x512xf32, #tpu.memory_space<vmem>>, vector<8x128xf32>
    tpu.vector_store %arg6[%c0_21, %c0_22], %10 {strides = array<i32>} : memref<8x512xf32, #tpu.memory_space<vmem>>, vector<8x128xf32>,
    %c0_23 = arith.constant 0 : index
    %c128 = arith.constant 128 : index
    %30 = vector.load %arg6[%c0_23, %c128] : memref<8x512xf32, #tpu.memory_space<vmem>>, vector<8x384xf32>
    tpu.vector_store %arg6[%c0_23, %c128], %16 {strides = array<i32>} : memref<8x512xf32, #tpu.memory_space<vmem>>, vector<8x384xf32>,
    return
  }
}

</mosaic_0001>

<bundles_post_ra>
// kernel: tpu_custom_call.1
= control target key start
LH: loop header
LB: loop body
LE: loop exit
PB: predicated region body
PF: predicated region fallthrough
CT: control target
= control target key end

     0   :  { %13 = vsyncpa [#allocation3], 0  ;;  %s4141_s0 = inlined_call_operand.hbm [shape: bf16[8,32], index: 0, kind: input, shape index: {}]   ;;  %s4142_s1 = inlined_call_operand.hbm [shape: bf16[32,128], index: 1, kind: input, shape index: {}]   ;;  %s4143_s2 = inlined_call_operand.hbm [shape: bf16[32,384], index: 2, kind: input, shape index: {}]   ;;  %s4144_s3 = inlined_call_operand.hbm [shape: bf16[256,384], index: 3, kind: input, shape index: {}]   ;;  %s4145_s4 = inlined_call_operand.hbm [shape: bf16[128,768], index: 4, kind: input, shape index: {}]   ;;  %s4146_s5 = inlined_call_operand.vmem [shape: f32[1,1536], index: 5, kind: input, shape index: {}]   ;;  %s4147_s6 = inlined_call_operand.hbm [shape: f32[8,512], index: 6, kind: output, shape index: {0}]   ;;  %s4148_s7 = inlined_call_operand.vmem [shape: f32[8,64,32], index: 7, kind: output, shape index: {1}]  }
   0x1   :  { %14 = vsyncpa [#allocation6], 0 }
   0x2   :  { %15 = vsyncpa [#allocation9], 0 }
   0x3   :  { %16 = vsyncpa [#allocation4], 0  ;;  %s3551_s24 = smov [#allocation5]   ;;  %s3411_s28 = scalar_lea.hbm %s4142_s1, 256 }
   0x4   :  { %s32_s25 = sshll.u32 %s3551_s24, 4  ;;  %p3412_p0 = scmp.ne.s32.totalorder %s4142_s1, %s3411_s28  ;;  %s33_s25 = int_to_ptr.vmem [resolvable:$true] %s32_s25 }
   0x5   :  { %p3415_p1 = scmp.lt.u32.totalorder %s3411_s28, %s4142_s1 }
   0x7   :  { %p3417_p2 = pnand %p3415_p1, %p3412_p0 }
   0x9   :  { %3420 = shalt.err (!%p3417_p2)
}
   0xa   :  { %s3421_s10 = scalar_lea.vmem %s33_s25, 256  ;;  %p3426_p4 = scmp.lt.s32.totalorder %s33_s25, %s33_s25 }
   0xb   :  { %p3422_p3 = scmp.ne.s32.totalorder %s33_s25, %s3421_s10  ;;  %p3427_p5 = scmp.lt.s32.totalorder %s3421_s10, %s3421_s10 }
   0xd   :  { %p3428_p6 = por %p3427_p5, %p3426_p4 }
   0xf   :  { %p3429_p7 = pnand %p3428_p6, %p3422_p3 }
  0x11   :  { %3432 = shalt.err (!%p3429_p7)
}
  0x12   :  { %s3552_s11 = smov 64   ;;  %s3553_s12 = smov 4  }
  0x13   :  { %38 = dma.hbm_to_vmem [thread:$0]  %s4142_s1, 256, %s33_s25, [#allocation6], %s3552_s11, %s3552_s11, %s3553_s12  }
  0x14   :  { %s3554_s15 = smov [#allocation8]   ;;  %s3555_s17 = smov [#allocation2]  }
  0x15   :  { %s56_s16 = sshll.u32 %s3554_s15, 4  ;;  %s23_s18 = sshll.u32 %s3555_s17, 4  ;;  %s57_s16 = int_to_ptr.vmem [resolvable:$true] %s56_s16  ;;  %s24_s18 = int_to_ptr.vmem [resolvable:$true] %s23_s18 }
  0x16   :  { %s3433_s21 = scalar_lea.hbm %s4144_s3, 6144 }
  0x17   :  { %p3434_p8 = scmp.ne.s32.totalorder %s4144_s3, %s3433_s21  ;;  %p3437_p9 = scmp.lt.u32.totalorder %s3433_s21, %s4144_s3 }
  0x19   :  { %p3439_p10 = pnand %p3437_p9, %p3434_p8 }
  0x1b   :  { %3442 = shalt.err (!%p3439_p10)
}
  0x1c   :  { %s3443_s1 = scalar_lea.vmem %s57_s16, 6144  ;;  %p3448_p12 = scmp.lt.s32.totalorder %s57_s16, %s57_s16 }
  0x1d   :  { %p3444_p11 = scmp.ne.s32.totalorder %s57_s16, %s3443_s1  ;;  %p3449_p13 = scmp.lt.s32.totalorder %s3443_s1, %s3443_s1 }
  0x1f   :  { %p3450_p0 = por %p3449_p13, %p3448_p12 }
  0x21   :  { %p3451_p1 = pnand %p3450_p0, %p3444_p11 }
  0x23   :  { %3454 = shalt.err (!%p3451_p1)
}
  0x24   :  { %s3556_s25 = smov 192   ;;  %s3557_s27 = smov 12  }
  0x25   :  { %62 = dma.hbm_to_vmem [thread:$0]  %s4144_s3, 6144, %s57_s16, [#allocation9], %s3556_s25, %s3556_s25, %s3557_s27  }
  0x26   :  { %s3455_s9 = scalar_lea.hbm %s4141_s0, 64 }
  0x27   :  { %p3456_p2 = scmp.ne.s32.totalorder %s4141_s0, %s3455_s9  ;;  %p3459_p3 = scmp.lt.u32.totalorder %s3455_s9, %s4141_s0 }
  0x29   :  { %p3461_p4 = pnand %p3459_p3, %p3456_p2 }
  0x2b   :  { %3464 = shalt.err (!%p3461_p4)
}
  0x2c   :  { %s3465_s15 = scalar_lea.vmem %s24_s18, 64  ;;  %p3470_p6 = scmp.lt.s32.totalorder %s24_s18, %s24_s18 }
  0x2d   :  { %p3466_p5 = scmp.ne.s32.totalorder %s24_s18, %s3465_s15  ;;  %p3471_p7 = scmp.lt.s32.totalorder %s3465_s15, %s3465_s15 }
  0x2f   :  { %p3472_p8 = por %p3471_p7, %p3470_p6 }
  0x31   :  { %p3473_p9 = pnand %p3472_p8, %p3466_p5 }
  0x33   :  { %3476 = shalt.err (!%p3473_p9)
}
  0x34   :  { %26 = dma.hbm_to_vmem [thread:$0]  %s4141_s0, 64, %s24_s18, [#allocation3]  }
  0x35   :  { %s3558_s17 = smov [#allocation7]   ;;  %s3559_s20 = smov [#allocation10]  }
  0x36   :  { %s44_s19 = sshll.u32 %s3558_s17, 4  ;;  %s68_s21 = sshll.u32 %s3559_s20, 4  ;;  %s45_s19 = int_to_ptr.vmem [resolvable:$true] %s44_s19  ;;  %s69_s21 = int_to_ptr.vmem [resolvable:$true] %s68_s21 }
  0x37   :  { %s3477_s24 = scalar_lea.hbm %s4143_s2, 768 }
  0x38   :  { %p3478_p10 = scmp.ne.s32.totalorder %s4143_s2, %s3477_s24  ;;  %p3481_p11 = scmp.lt.u32.totalorder %s3477_s24, %s4143_s2 }
  0x3a   :  { %p3483_p12 = pnand %p3481_p11, %p3478_p10 }
  0x3c   :  { %3486 = shalt.err (!%p3483_p12)
}
  0x3d   :  { %s3487_s0 = scalar_lea.vmem %s45_s19, 768  ;;  %p3492_p0 = scmp.lt.s32.totalorder %s45_s19, %s45_s19 }
  0x3e   :  { %p3488_p13 = scmp.ne.s32.totalorder %s45_s19, %s3487_s0  ;;  %p3493_p1 = scmp.lt.s32.totalorder %s3487_s0, %s3487_s0 }
  0x40   :  { %p3494_p2 = por %p3493_p1, %p3492_p0 }
  0x42   :  { %p3495_p3 = pnand %p3494_p2, %p3488_p13 }
  0x44   :  { %3498 = shalt.err (!%p3495_p3)
}
  0x45   :  { %50 = dma.hbm_to_vmem [thread:$0]  %s4143_s2, 768, %s45_s19, [#allocation6], %s3556_s25, %s3556_s25, %s3557_s27  }
  0x46   :  { %s3499_s10 = scalar_lea.hbm %s4145_s4, 6144 }
  0x47   :  { %p3500_p4 = scmp.ne.s32.totalorder %s4145_s4, %s3499_s10  ;;  %p3503_p5 = scmp.lt.u32.totalorder %s3499_s10, %s4145_s4 }
  0x49   :  { %p3505_p6 = pnand %p3503_p5, %p3500_p4 }
  0x4b   :  { %3508 = shalt.err (!%p3505_p6)
}
  0x4c   :  { %s3509_s3 = scalar_lea.vmem %s69_s21, 6144  ;;  %p3514_p8 = scmp.lt.s32.totalorder %s69_s21, %s69_s21 }
  0x4d   :  { %p3510_p7 = scmp.ne.s32.totalorder %s69_s21, %s3509_s3  ;;  %p3515_p9 = scmp.lt.s32.totalorder %s3509_s3, %s3509_s3 }
  0x4f   :  { %p3516_p10 = por %p3515_p9, %p3514_p8 }
  0x51   :  { %p3517_p11 = pnand %p3516_p10, %p3510_p7 }
  0x53   :  { %3520 = shalt.err (!%p3517_p11)
}
  0x54   :  { %s3560_s2 = smov 384   ;;  %s3561_s25 = smov 24  }
  0x55   :  { %74 = dma.hbm_to_vmem [thread:$0]  %s4145_s4, 6144, %s69_s21, [#allocation9], %s3560_s2, %s3560_s2, %s3561_s25  }
  0x56   :  { %3543 = dma.done.wait [#allocation3], 64  }
  0x57   :  { %3544 = vsyncadd [#allocation3], 4294967232 }
  0x58   :  { %3545 = dma.done.wait [#allocation6], 1024  }
  0x59   :  { %3546 = vsyncadd [#allocation6], 4294966272 }
  0x5a   :  { %3547 = dma.done.wait [#allocation9], 12288  }
  0x5b   :  { %3548 = vsyncadd [#allocation9], 4294955008  ;;  %v3562_v0 = vmov 0   ;;  %v3563_v1 = vmov 0.0   ;;  %vm3564_vm0 = vmmov 0   ;;  %vm151_vm1 = vcmask 261120  }
  0x5c   :  { %187 = vmatprep.mubr.bf16.mxu0 %v3562_v0  ;;  %3116 = vmatprep.subr.bf16.mxu1 %v3563_v1  ;;  %v3265_v2 = vld [vmem:[#allocation7 + $0x4] ss:$12 sps:$4 sm:$0xff]   ;;  %v3267_v3 = vld [vmem:[#allocation7] ss:$12 sps:$4 sm:$0xff]   ;;  %v3268_v4 = vld [vmem:[#allocation7 + $0x1c] ss:$12 sps:$4 sm:$0xff]   ;;  %v104_v61 = vlaneseq }
  0x5d   :  { %3120 = vmatprep.mubr.msk.bf16.mxu1 %vm3564_vm0, %v3563_v1  ;;  %155 = vmatprep.subr.bf16.mxu0 %v3265_v2  ;;  %v3270_v5 = vld [vmem:[#allocation7 + $0x18] ss:$12 sps:$4 sm:$0xff]   ;;  %v3271_v6 = vld [vmem:[#allocation7 + $0x8] ss:$12 sps:$4 sm:$0xff]   ;;  %v3272_v7 = vld [vmem:[#allocation7 + $0x20] ss:$12 sps:$4 sm:$0xff]  }
  0x5e   :  { %156 = vmatpush1.bf16.msra.mxu0 %v3267_v3  ;;  %3117 = vmatpush3.bf16.msra.mxu1 %v3271_v6  ;;  %v3275_v8 = vld [vmem:[#allocation8 + $0x4] ss:$12 sps:$4 sm:$0xff]   ;;  %v93_v9 = vld [vmem:[#allocation2] sm:$0xf]  ;;  %v3273_v10 = vld [vmem:[#allocation8] ss:$12 sps:$4 sm:$0xff]  }
  0x5f   :  { %157 = vmatprep.subr.bf16.mxu0 %v3268_v4  ;;  %3118 = vmatprep.subr.bf16.mxu1 %v3563_v1  ;;  %v3278_v11 = vld [vmem:[#allocation8 + $0x1c] ss:$12 sps:$4 sm:$0xff]   ;;  %v3276_v12 = vld [vmem:[#allocation8 + $0x18] ss:$12 sps:$4 sm:$0xff]   ;;  %v3281_v14 = vld [vmem:[#allocation8 + $0x34] ss:$12 sps:$4 sm:$0xff]  }
  0x60   :  { %v3291_v13 = vld [vmem:[#allocation5] sm:$0xff]   ;;  %v3295_v15 = vld [vmem:[#allocation5 + $0x8] sm:$0xff]   ;;  %v3279_v16 = vld [vmem:[#allocation8 + $0x30] ss:$12 sps:$4 sm:$0xff]   ;;  %v3684_v62 = vshrl.u32 %v104_v61, 7  ;;  %s3566_s23 = smov 32  }
  0x61   :  { %v3284_v17 = vld [vmem:[#allocation8 + $0x4c] ss:$12 sps:$4 sm:$0xff]   ;;  %v3302_v18 = vld [vmem:[#allocation8 + $0xc8] ss:$12 sps:$4 sm:$0xff]   ;;  %v3287_v21 = vld [vmem:[#allocation8 + $0x64] ss:$12 sps:$4 sm:$0xff]  }
  0x62   :  { %158 = vmatpush1.bf16.msra.mxu0 %v3270_v5  ;;  %3119 = vmatpush3.bf16.msra.mxu1 %v3272_v7  ;;  %v3303_v19 = vld [vmem:[#allocation8 + $0x8] ss:$12 sps:$4 sm:$0xff]   ;;  %v3307_v22 = vld [vmem:[#allocation8 + $0xe0] ss:$12 sps:$4 sm:$0xff]   ;;  %v3312_v26 = vld [vmem:[#allocation8 + $0xf8] ss:$12 sps:$4 sm:$0xff]  }
  0x63   :  { %3124 = vmatprep.subr.bf16.mxu0 %v3563_v1  ;;  %635 = vmatprep.subr.bf16.mxu1 %v3275_v8  ;;  %v3282_v20 = vld [vmem:[#allocation8 + $0x48] ss:$12 sps:$4 sm:$0xff]   ;;  %v3308_v23 = vld [vmem:[#allocation8 + $0x20] ss:$12 sps:$4 sm:$0xff]   ;;  %v3313_v27 = vld [vmem:[#allocation8 + $0x38] ss:$12 sps:$4 sm:$0xff]  }
  0x64   :  { %v3285_v24 = vld [vmem:[#allocation8 + $0x60] ss:$12 sps:$4 sm:$0xff]   ;;  %v3290_v25 = vld [vmem:[#allocation8 + $0x7c] ss:$12 sps:$4 sm:$0xff]   ;;  %v3288_v28 = vld [vmem:[#allocation8 + $0x78] ss:$12 sps:$4 sm:$0xff]  }
  0x65   :  { %2851 = vmatmul.mubr.msk.bf16.vlgmr.msra.gmra.mrb[0].mxu0 %vm151_vm1, %v93_v9  ;;  %3121 = vmatmul.mubr.msk.bf16.vlgmr.msra.gmra.mrb[0].mxu1 %vm151_vm1, %v93_v9  ;;  %v3317_v29 = vld [vmem:[#allocation8 + $0x110] ss:$12 sps:$4 sm:$0xff]   ;;  %v3294_v30 = vld [vmem:[#allocation8 + $0x94] ss:$12 sps:$4 sm:$0xff]   ;;  %v3298_v34 = vld [vmem:[#allocation8 + $0xac] ss:$12 sps:$4 sm:$0xff]  }
  0x66   :  { %3128 = vmatprep.mubr.msk.bf16.mxu0 %vm3564_vm0, %v3563_v1  ;;  %636 = vmatpush1.bf16.msra.mxu1 %v3273_v10  ;;  %v3318_v31 = vld [vmem:[#allocation8 + $0x50] ss:$12 sps:$4 sm:$0xff]   ;;  %v3322_v33 = vld [vmem:[#allocation8 + $0x128] ss:$12 sps:$4 sm:$0xff]   ;;  %v3327_v37 = vld [vmem:[#allocation8 + $0x140] ss:$12 sps:$4 sm:$0xff]  }
  0x67   :  { %637 = vmatprep.subr.bf16.mxu1 %v3278_v11  ;;  %3125 = vmatpush3.bf16.msra.mxu0 %v3291_v13  ;;  %v3292_v32 = vld [vmem:[#allocation8 + $0x90] ss:$12 sps:$4 sm:$0xff]   ;;  %v3296_v35 = vld [vmem:[#allocation8 + $0xa8] ss:$12 sps:$4 sm:$0xff]   ;;  %v3328_v39 = vld [vmem:[#allocation8 + $0x80] ss:$12 sps:$4 sm:$0xff]  }
  0x68   :  { %3126 = vmatprep.subr.bf16.mxu0 %v3563_v1  ;;  %v3323_v36 = vld [vmem:[#allocation8 + $0x68] ss:$12 sps:$4 sm:$0xff]   ;;  %v3301_v38 = vld [vmem:[#allocation8 + $0xc4] ss:$12 sps:$4 sm:$0xff]   ;;  %v3299_v40 = vld [vmem:[#allocation8 + $0xc0] ss:$12 sps:$4 sm:$0xff]  }
  0x69   :  { %v3306_v41 = vld [vmem:[#allocation8 + $0xdc] ss:$12 sps:$4 sm:$0xff]   ;;  %v3304_v42 = vld [vmem:[#allocation8 + $0xd8] ss:$12 sps:$4 sm:$0xff]   ;;  %v3311_v43 = vld [vmem:[#allocation8 + $0xf4] ss:$12 sps:$4 sm:$0xff]  }
  0x6a   :  { %638 = vmatpush1.bf16.msra.mxu1 %v3276_v12  ;;  %v3309_v44 = vld [vmem:[#allocation8 + $0xf0] ss:$12 sps:$4 sm:$0xff]   ;;  %v3316_v45 = vld [vmem:[#allocation8 + $0x10c] ss:$12 sps:$4 sm:$0xff]   ;;  %v3314_v46 = vld [vmem:[#allocation8 + $0x108] ss:$12 sps:$4 sm:$0xff]  }
  0x6b   :  { %639 = vmatprep.subr.bf16.mxu1 %v3281_v14  ;;  %3127 = vmatpush3.bf16.msra.mxu0 %v3295_v15  ;;  %v3321_v47 = vld [vmem:[#allocation8 + $0x124] ss:$12 sps:$4 sm:$0xff]   ;;  %v3319_v48 = vld [vmem:[#allocation8 + $0x120] ss:$12 sps:$4 sm:$0xff]   ;;  %v3326_v49 = vld [vmem:[#allocation8 + $0x13c] ss:$12 sps:$4 sm:$0xff]  }
  0x6c   :  { %3022 = vmatprep.subr.bf16.mxu0 %v3302_v18  ;;  %v3324_v50 = vld [vmem:[#allocation8 + $0x138] ss:$12 sps:$4 sm:$0xff]   ;;  %v3331_v51 = vld [vmem:[#allocation8 + $0x154] ss:$12 sps:$4 sm:$0xff]   ;;  %v3329_v53 = vld [vmem:[#allocation8 + $0x150] ss:$12 sps:$4 sm:$0xff]  }
  0x6d   :  { %v3332_v52 = vld [vmem:[#allocation8 + $0x158] ss:$12 sps:$4 sm:$0xff]   ;;  %v3337_v56 = vld [vmem:[#allocation8 + $0x170] ss:$12 sps:$4 sm:$0xff]   ;;  %v3334_v57 = vld [vmem:[#allocation8 + $0x168] ss:$12 sps:$4 sm:$0xff]  }
  0x6e   :  { %640 = vmatpush1.bf16.msra.mxu1 %v3279_v16  ;;  %3129 = vmatmul.mubr.msk.bf16.vlgmr.msra.gmra.mrb[4].mxu0 %vm151_vm1, %v93_v9  ;;  %v3333_v54 = vld [vmem:[#allocation8 + $0x98] ss:$12 sps:$4 sm:$0xff]   ;;  %v3338_v58 = vld [vmem:[#allocation8 + $0xb0] ss:$12 sps:$4 sm:$0xff]   ;;  %v3687_v63 = vsub.s32 0, %v3684_v62  ;;  %v3695_v2 = vsub.s32 1, %v3684_v62 }
  0x6f   :  { %641 = vmatprep.subr.bf16.mxu1 %v3284_v17  ;;  %3023 = vmatpush3.bf16.msra.mxu0 %v3303_v19  ;;  %v3336_v55 = vld [vmem:[#allocation8 + $0x16c] ss:$12 sps:$4 sm:$0xff]   ;;  %v3341_v59 = vld [vmem:[#allocation10 + $0x4] ss:$24 sps:$4 sm:$0xff]   ;;  %v3342_v19 = vld [vmem:[#allocation10 + $0x8] ss:$24 sps:$4 sm:$0xff]  }
  0x70   :  { %3024 = vmatprep.subr.bf16.mxu0 %v3307_v22  ;;  %v3344_v60 = vld [vmem:[#allocation10 + $0xc] ss:$24 sps:$4 sm:$0xff]   ;;  %v3339_v18 = vld [vmem:[#allocation10] ss:$24 sps:$4 sm:$0xff]   ;;  %v3350_v22 = vld [vmem:[#allocation10 + $0x3c] ss:$24 sps:$4 sm:$0xff]  }
  0x71   :  { %v3692_v1 = vld [vmem:[%s4146_s5] sm:$0x7]  ;;  %v3390_v61 = vld [vmem:[#allocation10 + $0x40] ss:$24 sps:$4 sm:$0xff]   ;;  %vm1499_vm2 = vcmask 64512  }
  0x72   :  { %642 = vmatpush1.bf16.msra.mxu1 %v3282_v20  ;;  %v107_v3 = vrot.slane %v3692_v1, %v3687_v63  ;;  %v111_v4 = vrot.slane %v3692_v1, %v3695_v2 }
  0x73   :  { %643 = vmatprep.subr.bf16.mxu1 %v3287_v21  ;;  %3025 = vmatpush3.bf16.msra.mxu0 %v3308_v23  ;;  %v3347_v21 = vld [vmem:[#allocation10 + $0x34] ss:$24 sps:$4 sm:$0xff]   ;;  %v3345_v23 = vld [vmem:[#allocation10 + $0x30] ss:$24 sps:$4 sm:$0xff]  }
  0x74   :  { %3026 = vmatprep.subr.bf16.mxu0 %v3312_v26  ;;  %v3356_v26 = vld [vmem:[#allocation10 + $0x6c] ss:$24 sps:$4 sm:$0xff]  }
  0x76   :  { %644 = vmatpush1.bf16.msra.mxu1 %v3285_v24  ;;  %v3348_v24 = vld [vmem:[#allocation10 + $0x38] ss:$24 sps:$4 sm:$0xff]  }
  0x77   :  { %645 = vmatprep.subr.bf16.mxu1 %v3290_v25  ;;  %3027 = vmatpush3.bf16.msra.mxu0 %v3313_v27  ;;  %v3353_v25 = vld [vmem:[#allocation10 + $0x64] ss:$24 sps:$4 sm:$0xff]  }
  0x78   :  { %3028 = vmatprep.subr.bf16.mxu0 %v3317_v29  ;;  %v3351_v29 = vld [vmem:[#allocation10 + $0x60] ss:$24 sps:$4 sm:$0xff]  }
  0x7a   :  { %646 = vmatpush1.bf16.msra.mxu1 %v3288_v28 }
  0x7b   :  { %647 = vmatprep.subr.bf16.mxu1 %v3294_v30  ;;  %3029 = vmatpush3.bf16.msra.mxu0 %v3318_v31  ;;  %v3354_v30 = vld [vmem:[#allocation10 + $0x68] ss:$24 sps:$4 sm:$0xff]  }
  0x7c   :  { %3030 = vmatprep.subr.bf16.mxu0 %v3322_v33  ;;  %v3362_v33 = vld [vmem:[#allocation10 + $0x9c] ss:$24 sps:$4 sm:$0xff]  }
  0x7e   :  { %648 = vmatpush1.bf16.msra.mxu1 %v3292_v32  ;;  %v3359_v32 = vld [vmem:[#allocation10 + $0x94] ss:$24 sps:$4 sm:$0xff]  }
  0x7f   :  { %649 = vmatprep.subr.bf16.mxu1 %v3298_v34  ;;  %3031 = vmatpush3.bf16.msra.mxu0 %v3323_v36  ;;  %v3360_v36 = vld [vmem:[#allocation10 + $0x98] ss:$24 sps:$4 sm:$0xff]  }
  0x80   :  { %3032 = vmatprep.subr.bf16.mxu0 %v3327_v37  ;;  %v3365_v37 = vld [vmem:[#allocation10 + $0xc4] ss:$24 sps:$4 sm:$0xff]  }
  0x82   :  { %650 = vmatpush1.bf16.msra.mxu1 %v3296_v35  ;;  %v3357_v35 = vld [vmem:[#allocation10 + $0x90] ss:$24 sps:$4 sm:$0xff]  }
  0x83   :  { %651 = vmatprep.subr.bf16.mxu1 %v3301_v38  ;;  %3033 = vmatpush3.bf16.msra.mxu0 %v3328_v39  ;;  %v3368_v38 = vld [vmem:[#allocation10 + $0xcc] ss:$24 sps:$4 sm:$0xff]   ;;  %v3706_v39 = vsub.s32 2, %v3684_v62 }
  0x84   :  { %3034 = vmatprep.subr.bf16.mxu0 %v3332_v52  ;;  %v3383_v52 = vld [vmem:[#allocation10 + $0x154] ss:$24 sps:$4 sm:$0xff]  }
  0x86   :  { %652 = vmatpush1.bf16.msra.mxu1 %v3299_v40  ;;  %v3363_v40 = vld [vmem:[#allocation10 + $0xc0] ss:$24 sps:$4 sm:$0xff]  }
  0x87   :  { %653 = vmatprep.subr.bf16.mxu1 %v3306_v41  ;;  %3035 = vmatpush3.bf16.msra.mxu0 %v3333_v54  ;;  %v3366_v41 = vld [vmem:[#allocation10 + $0xc8] ss:$24 sps:$4 sm:$0xff]  }
  0x88   :  { %3036 = vmatprep.subr.bf16.mxu0 %v3337_v56  ;;  %v3384_v56 = vld [vmem:[#allocation10 + $0x158] ss:$24 sps:$4 sm:$0xff]  }
  0x8a   :  { %654 = vmatpush1.bf16.msra.mxu1 %v3304_v42  ;;  %v3371_v42 = vld [vmem:[#allocation10 + $0xf4] ss:$24 sps:$4 sm:$0xff]  }
  0x8b   :  { %655 = vmatprep.subr.bf16.mxu1 %v3311_v43  ;;  %3037 = vmatpush3.bf16.msra.mxu0 %v3338_v58  ;;  %v3374_v43 = vld [vmem:[#allocation10 + $0xfc] ss:$24 sps:$4 sm:$0xff]  }
  0x8c   :  { %1036 = vmatprep.subr.bf16.mxu0 %v3341_v59  ;;  %v3387_v59 = vld [vmem:[#allocation10 + $0x10] ss:$24 sps:$4 sm:$0xff]  }
  0x8e   :  { %656 = vmatpush1.bf16.msra.mxu1 %v3309_v44  ;;  %v115_v44 = vrot.slane %v3692_v1, %v3706_v39  ;;  %v3395_v1 = vld [vmem:[#allocation10 + $0x74] ss:$24 sps:$4 sm:$0xff]  }
  0x8f   :  { %657 = vmatprep.subr.bf16.mxu1 %v3316_v45  ;;  %v3369_v45 = vld [vmem:[#allocation10 + $0xf0] ss:$24 sps:$4 sm:$0xff]  }
  0x92   :  { %658 = vmatpush1.bf16.msra.mxu1 %v3314_v46  ;;  %v3372_v46 = vld [vmem:[#allocation10 + $0xf8] ss:$24 sps:$4 sm:$0xff]  }
  0x93   :  { %659 = vmatprep.subr.bf16.mxu1 %v3321_v47  ;;  %v3377_v47 = vld [vmem:[#allocation10 + $0x124] ss:$24 sps:$4 sm:$0xff]  }
  0x96   :  { %660 = vmatpush1.bf16.msra.mxu1 %v3319_v48  ;;  %v3380_v48 = vld [vmem:[#allocation10 + $0x12c] ss:$24 sps:$4 sm:$0xff]  }
  0x97   :  { %661 = vmatprep.subr.bf16.mxu1 %v3326_v49 }
  0x9a   :  { %662 = vmatpush1.bf16.msra.mxu1 %v3324_v50  ;;  %v3375_v50 = vld [vmem:[#allocation10 + $0x120] ss:$24 sps:$4 sm:$0xff]  }
  0x9b   :  { %663 = vmatprep.subr.bf16.mxu1 %v3331_v51  ;;  %v3378_v51 = vld [vmem:[#allocation10 + $0x128] ss:$24 sps:$4 sm:$0xff]  }
  0x9e   :  { %664 = vmatpush1.bf16.msra.mxu1 %v3329_v53  ;;  %v3386_v53 = vld [vmem:[#allocation10 + $0x15c] ss:$24 sps:$4 sm:$0xff]  }
  0x9f   :  { %665 = vmatprep.subr.bf16.mxu1 %v3336_v55  ;;  %v3381_v55 = vld [vmem:[#allocation10 + $0x150] ss:$24 sps:$4 sm:$0xff]  }
  0xa2   :  { %666 = vmatpush1.bf16.msra.mxu1 %v3334_v57  ;;  %v3389_v57 = vld [vmem:[#allocation10 + $0x14] ss:$24 sps:$4 sm:$0xff]  }
  0xa3   :  { %1077 = vmatprep.subr.bf16.mxu1 %v3344_v60  ;;  %v3392_v60 = vld [vmem:[#allocation10 + $0x44] ss:$24 sps:$4 sm:$0xff]  }
 0x138   :  { %v189_v5 = vpop.f32.mrb[0].mxu0  ;;  %v3701_v10 = vpop.f32.mrb[0].mxu1 }
 0x139   :  { %v190_v6 = vadd.f32 %v189_v5, %v107_v3  ;;  %v191_v7 = vpop.f32.mrb[1].mxu0  ;;  %v3122_v13 = vpop.f32.mrb[1].mxu1  ;;  %v231_v49 = vadd.f32 %v3701_v10, %v115_v44  ;;  %v3393_v3 = vld [vmem:[#allocation10 + $0x70] ss:$24 sps:$4 sm:$0xff]   ;;  %v3396_v5 = vld [vmem:[#allocation10 + $0xa0] ss:$24 sps:$4 sm:$0xff]  }
 0x13a   :  { %v192_v8 = vadd.f32 %v191_v7, %v111_v4  ;;  %v193_v9 = vpop.f32.mrb[2].mxu0  ;;  %v233_v15 = vpop.f32.mrb[2].mxu1  ;;  %v3398_v4 = vld [vmem:[#allocation10 + $0xa4] ss:$24 sps:$4 sm:$0xff]   ;;  %v3399_v7 = vld [vmem:[#allocation10 + $0xd0] ss:$24 sps:$4 sm:$0xff]  }
 0x13b   :  { %v236_v11 = vmax.f32 %v190_v6, 0.0  ;;  %v194_v12 = vpop.f32.mrb[3].mxu0  ;;  %v3123_v16 = vpop.f32.mrb[3].mxu1  ;;  %v238_v54 = vmax.f32 %v231_v49, 0.0  ;;  %v3401_v6 = vld [vmem:[#allocation10 + $0xd4] ss:$24 sps:$4 sm:$0xff]  }
 0x13c   :  { %v237_v14 = vmax.f32 %v192_v8, 0.0  ;;  %v3404_v8 = vld [vmem:[#allocation10 + $0x104] ss:$24 sps:$4 sm:$0xff]   ;;  %v3402_v9 = vld [vmem:[#allocation10 + $0x100] ss:$24 sps:$4 sm:$0xff]   ;;  %v784_v49 = vsub.s32 4, %v3684_v62 }
 0x13d   :  { %v239_v20 = vpack.c.bf16 %v236_v11, %v236_v11  ;;  %v241_v58 = vpack.c.bf16 %v238_v54, %v238_v54  ;;  %v3407_v10 = vld [vmem:[#allocation10 + $0x134] ss:$24 sps:$4 sm:$0xff]   ;;  %v3410_v11 = vld [vmem:[#allocation10 + $0x164] ss:$24 sps:$4 sm:$0xff]   ;;  %v3408_v12 = vld [vmem:[#allocation10 + $0x160] ss:$24 sps:$4 sm:$0xff]  }
 0x13e   :  { %v240_v17 = vpack.c.bf16 %v237_v14, %v237_v14  ;;  %v362_v13 = vld [vmem:[%s4146_s5 + $0x3] sm:$0x7] }
 0x13f   :  { %v367_v14 = vrot.slane %v362_v13, %v3687_v63  ;;  %v371_v15 = vrot.slane %v362_v13, %v3695_v2 }
 0x140   :  { %667 = vmatprep.mubr.bf16.mxu1 %v240_v17  ;;  %708 = vmatprep.mubr.bf16.mxu0 %v240_v17 }
 0x141   :  { %668 = vmatmul.mubr.bf16.vlgmr.msra.gmra.mrb[4].mxu1 %v239_v20  ;;  %709 = vmatmul.mubr.bf16.vlgmr.msra.gmra.mrb[8].mxu0 %v239_v20  ;;  %v292_v27 = vpop.f32.mrb[4].mxu0 }
 0x142   :  { %1037 = vmatpush1.bf16.msra.mxu0 %v3339_v18  ;;  %1078 = vmatpush1.bf16.msra.mxu1 %v3342_v19  ;;  %2820 = vst [vmem:[#allocation11] sm:$0xff] %v292_v27  ;;  %v3130_v28 = vpop.f32.mrb[5].mxu0  ;;  %v375_v18 = vrot.slane %v362_v13, %v3706_v39 }
 0x143   :  { %1038 = vmatprep.subr.bf16.mxu0 %v3347_v21  ;;  %1079 = vmatprep.subr.bf16.mxu1 %v3350_v22  ;;  %v295_v31 = vpop.f32.mrb[6].mxu0 }
 0x144   :  { %1068 = vmatprep.mubr.bf16.mxu0 %v3562_v0  ;;  %1109 = vmatprep.mubr.bf16.mxu1 %v3562_v0  ;;  %v3131_v34 = vpop.f32.mrb[7].mxu0 }
 0x146   :  { %1039 = vmatpush1.bf16.msra.mxu0 %v3345_v23  ;;  %1080 = vmatpush1.bf16.msra.mxu1 %v3348_v24 }
 0x147   :  { %1040 = vmatprep.subr.bf16.mxu0 %v3353_v25  ;;  %1081 = vmatprep.subr.bf16.mxu1 %v3356_v26 }
 0x14a   :  { %1041 = vmatpush1.bf16.msra.mxu0 %v3351_v29  ;;  %1082 = vmatpush1.bf16.msra.mxu1 %v3354_v30  ;;  %v764_v29 = vld [vmem:[%s4146_s5 + $0x6] sm:$0x3f]  ;;  %v780_v30 = vsub.s32 3, %v3684_v62  ;;  %s3565_s5 = smov 96  }
 0x14b   :  { %1042 = vmatprep.subr.bf16.mxu0 %v3359_v32  ;;  %1083 = vmatprep.subr.bf16.mxu1 %v3362_v33  ;;  %v769_v31 = vrot.slane %v764_v29, %v3687_v63  ;;  %v777_v32 = vrot.slane %v764_v29, %v3706_v39  ;;  %v773_v33 = vrot.slane %v764_v29, %v3695_v2 }
 0x14c   :  { %v781_v34 = vrot.slane %v764_v29, %v780_v30 }
 0x14e   :  { %1043 = vmatpush1.bf16.msra.mxu0 %v3357_v35  ;;  %1084 = vmatpush1.bf16.msra.mxu1 %v3360_v36 }
 0x14f   :  { %1044 = vmatprep.subr.bf16.mxu0 %v3365_v37  ;;  %1085 = vmatprep.subr.bf16.mxu1 %v3368_v38 }
 0x152   :  { %1045 = vmatpush1.bf16.msra.mxu0 %v3363_v40  ;;  %1086 = vmatpush1.bf16.msra.mxu1 %v3366_v41 }
 0x153   :  { %1046 = vmatprep.subr.bf16.mxu0 %v3371_v42  ;;  %1087 = vmatprep.subr.bf16.mxu1 %v3374_v43 }
 0x156   :  { %1047 = vmatpush1.bf16.msra.mxu0 %v3369_v45  ;;  %1088 = vmatpush1.bf16.msra.mxu1 %v3372_v46 }
 0x157   :  { %1048 = vmatprep.subr.bf16.mxu0 %v3377_v47  ;;  %1089 = vmatprep.subr.bf16.mxu1 %v3380_v48 }
 0x15a   :  { %1049 = vmatpush1.bf16.msra.mxu0 %v3375_v50  ;;  %1090 = vmatpush1.bf16.msra.mxu1 %v3378_v51  ;;  %v785_v50 = vrot.slane %v764_v29, %v784_v49  ;;  %v788_v51 = vsub.s32 5, %v3684_v62 }
 0x15b   :  { %1050 = vmatprep.subr.bf16.mxu0 %v3383_v52  ;;  %1091 = vmatprep.subr.bf16.mxu1 %v3386_v53 }
 0x15c   :  { %v789_v54 = vrot.slane %v764_v29, %v788_v51 }
 0x15e   :  { %1051 = vmatpush1.bf16.msra.mxu0 %v3381_v55  ;;  %1092 = vmatpush1.bf16.msra.mxu1 %v3384_v56 }
 0x15f   :  { %1118 = vmatprep.subr.bf16.mxu0 %v3389_v57 }
 0x161   :  { %1069 = vmatmul.mubr.bf16.vlgmr.msra.gmra.mrb[12].mxu0 %v241_v58  ;;  %1110 = vmatmul.mubr.bf16.vlgmr.msra.gmra.mrb[8].mxu1 %v241_v58 }
 0x162   :  { %1119 = vmatpush1.bf16.msra.mxu0 %v3387_v59  ;;  %1150 = vmatprep.mubr.bf16.mxu0 %v3562_v0  ;;  %v3405_v0 = vld [vmem:[#allocation10 + $0x130] ss:$24 sps:$4 sm:$0xff]   ;;  %v3567_v59 = vmov 1983009808  }
 0x163   :  { %1120 = vmatprep.subr.bf16.mxu0 %v3392_v60  ;;  %v1178_v60 = vunpack.c.l.s4 %v3567_v59 }
 0x166   :  { %1121 = vmatpush1.bf16.msra.mxu0 %v3390_v61  ;;  %v1179_v61 = vunpack.c.0.s8 %v1178_v60 }
 0x167   :  { %1122 = vmatprep.subr.bf16.mxu0 %v3395_v1  ;;  %v3568_v1 = vmov 1934713408  }
 0x16a   :  { %1123 = vmatpush1.bf16.msra.mxu0 %v3393_v3  ;;  %v1242_v3 = vunpack.c.l.s4 %v3568_v1 }
 0x16b   :  { %1124 = vmatprep.subr.bf16.mxu0 %v3398_v4 }
 0x16e   :  { %1125 = vmatpush1.bf16.msra.mxu0 %v3396_v5 }
 0x16f   :  { %1126 = vmatprep.subr.bf16.mxu0 %v3401_v6  ;;  %v3744_v6 = vsub.s32 %v1179_v61, %v3684_v62 }
 0x172   :  { %1127 = vmatpush1.bf16.msra.mxu0 %v3399_v7  ;;  %v1243_v7 = vunpack.c.0.s8 %v1242_v3 }
 0x173   :  { %1128 = vmatprep.subr.bf16.mxu0 %v3404_v8 }
 0x174   :  { %v3747_v13 = vsub.s32 %v1243_v7, %v3684_v62 }
 0x176   :  { %1129 = vmatpush1.bf16.msra.mxu0 %v3402_v9 }
 0x177   :  { %1130 = vmatprep.subr.bf16.mxu0 %v3407_v10 }
 0x17a   :  { %1131 = vmatpush1.bf16.msra.mxu0 %v3405_v0 }
 0x17b   :  { %1132 = vmatprep.subr.bf16.mxu0 %v3410_v11 }
 0x17e   :  { %1133 = vmatpush1.bf16.msra.mxu0 %v3408_v12 }
 0x181   :  { %1151 = vmatmul.mubr.bf16.vlgmr.msra.gmra.mrb[16].mxu0 %v241_v58 }
 0x214   :  { %v669_v16 = vpop.f32.mrb[4].mxu1  ;;  %v3038_v17 = vpop.f32.mrb[8].mxu0 }
 0x215   :  { %v670_v19 = vadd.f32 %v669_v16, %v367_v14  ;;  %v671_v20 = vpop.f32.mrb[5].mxu1  ;;  %v3039_v21 = vpop.f32.mrb[9].mxu0 }
 0x216   :  { %v672_v22 = vadd.f32 %v671_v20, %v371_v15  ;;  %v3040_v23 = vadd.f32 %v3039_v21, %v3038_v17  ;;  %v673_v24 = vpop.f32.mrb[6].mxu1  ;;  %v3041_v25 = vpop.f32.mrb[10].mxu0 }
 0x217   :  { %2821 = vst [vmem:[#allocation11 + $0x8] sm:$0xff] %v670_v19  ;;  %v674_v26 = vpop.f32.mrb[7].mxu1  ;;  %v3042_v27 = vpop.f32.mrb[11].mxu0 }
 0x218   :  { %2822 = vst [vmem:[#allocation11 + $0x10] sm:$0xff] %v672_v22  ;;  %v711_v28 = vadd.f32 %v3040_v23, %v375_v18 }
 0x21a   :  { %2823 = vst [vmem:[#allocation11 + $0x18] sm:$0xff] %v711_v28 }
 0x234   :  { %v1070_v35 = vpop.f32.mrb[12].mxu0  ;;  %v1111_v36 = vpop.f32.mrb[8].mxu1 }
 0x235   :  { %v1071_v37 = vadd.f32 %v1070_v35, %v769_v31  ;;  %v1112_v38 = vadd.f32 %v1111_v36, %v777_v32  ;;  %v1072_v40 = vpop.f32.mrb[13].mxu0  ;;  %v1113_v41 = vpop.f32.mrb[9].mxu1 }
 0x236   :  { %v1073_v42 = vadd.f32 %v1072_v40, %v773_v33  ;;  %v1114_v43 = vadd.f32 %v1113_v41, %v781_v34  ;;  %v1074_v44 = vpop.f32.mrb[14].mxu0  ;;  %v1115_v45 = vpop.f32.mrb[10].mxu1 }
 0x237   :  { %v1075_v46 = vpop.f32.mrb[15].mxu0  ;;  %1160 = vrot.lane.b32.xlu0 %v1071_v37, %s3552_s11  ;;  %v1116_v47 = vpop.f32.mrb[11].mxu1  ;;  %1168 = vrot.lane.b32.xlu1 %v1112_v38, %s3552_s11 }
 0x238   :  { %v1175_v63 = vcombine.low %v1071_v37, %v1073_v42  ;;  %v1176_v39 = vcombine.high %v1071_v37, %v1073_v42  ;;  %v1207_v2 = vcombine.low %v1112_v38, %v1114_v43  ;;  %v1208_v48 = vcombine.high %v1112_v38, %v1114_v43 }
 0x23a   :  { %v1183_v14 = vrot.slane %v1175_v63, %v3744_v6  ;;  %v1215_v15 = vrot.slane %v1207_v2, %v3744_v6  ;;  %v1190_v20 = vrot.slane %v1176_v39, %v3744_v6  ;;  %v1222_v21 = vrot.slane %v1208_v48, %v3744_v6 }
 0x23b   :  { %1164 = vrot.lane.b32.xlu0 %v1073_v42, %s3552_s11  ;;  %1172 = vrot.lane.b32.xlu1 %v1114_v43, %s3552_s11 }
 0x254   :  { %v1152_v52 = vpop.f32.mrb[16].mxu0 }
 0x255   :  { %v3731_v53 = vadd.f32 %v1152_v52, %v785_v50  ;;  %v1154_v55 = vpop.f32.mrb[17].mxu0 }
 0x256   :  { %v1156_v56 = vpop.f32.mrb[18].mxu0  ;;  %v3736_v58 = vadd.f32 %v1154_v55, %v789_v54 }
 0x257   :  { %v1157_v57 = vpop.f32.mrb[19].mxu0  ;;  %1312 = vrot.lane.b32.xlu0 %v3731_v53, %s3565_s5  ;;  %1315 = vrot.lane.b32.xlu1 %v3731_v53, %s3552_s11 }
 0x25b   :  { %1318 = vrot.lane.b32.xlu0 %v3731_v53, %s3566_s23  ;;  %1322 = vrot.lane.b32.xlu1 %v3736_v58, %s3565_s5 }
 0x25f   :  { %1325 = vrot.lane.b32.xlu0 %v3736_v58, %s3552_s11  ;;  %1328 = vrot.lane.b32.xlu1 %v3736_v58, %s3566_s23  ;;  %s3569_s11 = smov [#allocation11]  }
 0x260   :  { %s2830_s24 = sshll.u32 %s3569_s11, 4  ;;  %s2831_s24 = int_to_ptr.vmem [resolvable:$true] %s2830_s24 }
 0x261   :  { %s3521_s26 = scalar_lea.vmem %s2831_s24, 512  ;;  %p3526_p13 = scmp.lt.s32.totalorder %s2831_s24, %s2831_s24 }
 0x262   :  { %p3522_p12 = scmp.ne.s32.totalorder %s2831_s24, %s3521_s26  ;;  %p3527_p0 = scmp.lt.s32.totalorder %s3521_s26, %s3521_s26 }
 0x264   :  { %p3528_p1 = por %p3527_p0, %p3526_p13 }
 0x266   :  { %p3529_p2 = pnand %p3528_p1, %p3522_p12 }
 0x2a9   :  { %v1161_v4 = vpop.permute.xlu0 %1160  ;;  %v1169_v5 = vpop.permute.xlu1 %1168 }
 0x2ad   :  { %v1165_v8 = vpop.permute.xlu0 %1164  ;;  %v1173_v9 = vpop.permute.xlu1 %1172 }
 0x2ae   :  { %v1191_v10 = vcombine.low %v1161_v4, %v1165_v8  ;;  %v1192_v0 = vcombine.high %v1161_v4, %v1165_v8  ;;  %v1223_v11 = vcombine.low %v1169_v5, %v1173_v9  ;;  %v1224_v12 = vcombine.high %v1169_v5, %v1173_v9 }
 0x2b0   :  { %v1199_v16 = vrot.slane %v1191_v10, %v3744_v6  ;;  %v1206_v17 = vrot.slane %v1192_v0, %v3744_v6  ;;  %v1231_v18 = vrot.slane %v1223_v11, %v3744_v6  ;;  %v1238_v19 = vrot.slane %v1224_v12, %v3744_v6 }
 0x2b2   :  { %v1239_v22 = vcombine.low %v1183_v14, %v1199_v16  ;;  %v1271_v23 = vcombine.low %v1215_v15, %v1231_v18  ;;  %v1240_v62 = vcombine.high %v1183_v14, %v1199_v16  ;;  %v1272_v24 = vcombine.high %v1215_v15, %v1231_v18 }
 0x2b3   :  { %v1255_v25 = vcombine.low %v1190_v20, %v1206_v17  ;;  %v1287_v26 = vcombine.low %v1222_v21, %v1238_v19  ;;  %v1256_v27 = vcombine.high %v1190_v20, %v1206_v17  ;;  %v1288_v28 = vcombine.high %v1222_v21, %v1238_v19 }
 0x2b4   :  { %v1247_v29 = vrot.slane %v1239_v22, %v3747_v13  ;;  %v1279_v30 = vrot.slane %v1271_v23, %v3747_v13  ;;  %v1254_v31 = vrot.slane %v1240_v62, %v3747_v13  ;;  %v1286_v32 = vrot.slane %v1272_v24, %v3747_v13 }
 0x2b5   :  { %v3762_v33 = vrot.slane %v1255_v25, %v3747_v13  ;;  %v3765_v34 = vrot.slane %v1287_v26, %v3747_v13  ;;  %v3768_v35 = vrot.slane %v1256_v27, %v3747_v13  ;;  %v3771_v36 = vrot.slane %v1288_v28, %v3747_v13 }
 0x2b6   :  { %v1304_v37 = vcombine.high %v1247_v29, %v1279_v30  ;;  %v1303_v38 = vcombine.low %v1247_v29, %v1279_v30  ;;  %v1306_v40 = vcombine.high %v1254_v31, %v1286_v32  ;;  %v1305_v41 = vcombine.low %v1254_v31, %v1286_v32 }
 0x2b7   :  { %v1308_v42 = vcombine.high %v3762_v33, %v3765_v34  ;;  %v1307_v43 = vcombine.low %v3762_v33, %v3765_v34  ;;  %v1310_v44 = vcombine.high %v3768_v35, %v3771_v36  ;;  %v1309_v45 = vcombine.low %v3768_v35, %v3771_v36 }
 0x2b8   :  { %1629 = vxpose.xlu1.b32.start.end [1/1] (short) (narrow) %v1304_v37, 64  ;;  %1467 = vxpose.xlu0.b32.start.end [1/1] (short) (narrow) %v1303_v38, 64 }
 0x2c9   :  { %v1313_v46 = vpop.permute.xlu0 %1312  ;;  %v1316_v47 = vpop.permute.xlu1 %1315 }
 0x2ca   :  { %v1332_v63 = vcombine.high %v3731_v53, %v1316_v47  ;;  %v1331_v48 = vcombine.low %v3731_v53, %v1316_v47 }
 0x2cc   :  { %v1346_v51 = vrot.slane %v1332_v63, %v3744_v6  ;;  %v1339_v57 = vrot.slane %v1331_v48, %v3744_v6 }
 0x2cd   :  { %v1319_v39 = vpop.permute.xlu0 %1318  ;;  %v1323_v2 = vpop.permute.xlu1 %1322 }
 0x2ce   :  { %v1347_v49 = vcombine.low %v1313_v46, %v1319_v39  ;;  %v1348_v50 = vcombine.high %v1313_v46, %v1319_v39 }
 0x2d0   :  { %v1355_v52 = vrot.slane %v1347_v49, %v3744_v6  ;;  %v1362_v54 = vrot.slane %v1348_v50, %v3744_v6 }
 0x2d1   :  { %v1326_v55 = vpop.permute.xlu0 %1325  ;;  %v1329_v56 = vpop.permute.xlu1 %1328 }
 0x2d2   :  { %v1411_v59 = vcombine.low %v1346_v51, %v1362_v54  ;;  %v1412_v60 = vcombine.high %v1346_v51, %v1362_v54  ;;  %v1363_v61 = vcombine.low %v3736_v58, %v1326_v55  ;;  %v1364_v1 = vcombine.high %v3736_v58, %v1326_v55 }
 0x2d3   :  { %v1379_v3 = vcombine.low %v1323_v2, %v1329_v56  ;;  %v1380_v53 = vcombine.high %v1323_v2, %v1329_v56  ;;  %v1395_v4 = vcombine.low %v1339_v57, %v1355_v52  ;;  %v1396_v5 = vcombine.high %v1339_v57, %v1355_v52 }
 0x2d4   :  { %v1419_v7 = vrot.slane %v1411_v59, %v3747_v13  ;;  %v1426_v8 = vrot.slane %v1412_v60, %v3747_v13  ;;  %v1371_v9 = vrot.slane %v1363_v61, %v3744_v6  ;;  %v1378_v10 = vrot.slane %v1364_v1, %v3744_v6 }
 0x2d5   :  { %v1387_v0 = vrot.slane %v1379_v3, %v3744_v6  ;;  %v1394_v11 = vrot.slane %v1380_v53, %v3744_v6  ;;  %1951 = vxpose.xlu1.b32.start.end [1/1] (short) (narrow) %v1306_v40, 64  ;;  %1790 = vxpose.xlu0.b32.start.end [1/1] (short) (narrow) %v1305_v41, 64  ;;  %v1403_v16 = vrot.slane %v1395_v4, %v3747_v13 }
 0x2d6   :  { %v1410_v17 = vrot.slane %v1396_v5, %v3747_v13 }
 0x2d7   :  { %v1427_v12 = vcombine.low %v1371_v9, %v1387_v0  ;;  %v1428_v58 = vcombine.high %v1371_v9, %v1387_v0  ;;  %v1443_v14 = vcombine.low %v1378_v10, %v1394_v11  ;;  %v1444_v15 = vcombine.high %v1378_v10, %v1394_v11 }
 0x2d9   :  { %v1435_v18 = vrot.slane %v1427_v12, %v3747_v13  ;;  %v1442_v19 = vrot.slane %v1428_v58, %v3747_v13  ;;  %v1451_v20 = vrot.slane %v1443_v14, %v3747_v13  ;;  %v1458_v21 = vrot.slane %v1444_v15, %v3747_v13 }
 0x2db   :  { %v1459_v22 = vcombine.low %v1403_v16, %v1435_v18  ;;  %v1460_v6 = vcombine.high %v1403_v16, %v1435_v18  ;;  %v1461_v23 = vcombine.low %v1410_v17, %v1442_v19  ;;  %v1464_v62 = vcombine.high %v1419_v7, %v1451_v20 }
 0x2dc   :  { %v1463_v24 = vcombine.low %v1419_v7, %v1451_v20  ;;  %v3801_v25 = vcombine.low %v1426_v8, %v1458_v21  ;;  %v3803_v26 = vcombine.high %v1426_v8, %v1458_v21  ;;  %v1462_v27 = vcombine.high %v1410_v17, %v1442_v19 }
 0x2dd   :  { %3132 = vmatprep.subr.mxu1 %v1459_v22  ;;  %3146 = vmatprep.subr.mxu0 %v1460_v6 }
 0x2de   :  { %3133 = vmatpush3.msra.mxu1 %v1459_v22  ;;  %3147 = vmatpush3.msra.mxu0 %v1460_v6 }
 0x2df   :  { %3244 = vmatprep.subr.mxu1 %v1460_v6  ;;  %3174 = vmatprep.subr.mxu0 %v1462_v27 }
 0x2f2   :  { %2273 = vxpose.xlu1.b32.start.end [1/1] (short) (narrow) %v1308_v42, 64  ;;  %2112 = vxpose.xlu0.b32.start.end [1/1] (short) (narrow) %v1307_v43, 64 }
 0x30f   :  { %2595 = vxpose.xlu1.b32.start.end [1/1] (short) (narrow) %v1310_v44, 64  ;;  %2434 = vxpose.xlu0.b32.start.end [1/1] (short) (narrow) %v1309_v45, 64 }
 0x338   :  { %v1645_v13 = vpop.trf.xlu1  ;;  %v1483_v28 = vpop.trf.xlu0 }
 0x339   :  { %3134 = vmatprep.mubr.msk.f32.mxu1 %vm1499_vm2, %v1483_v28  ;;  %3148 = vmatprep.mubr.msk.f32.mxu0 %vm1499_vm2, %v1645_v13 }
 0x33c   :  { %v1646_v29 = vpop.trf.xlu1  ;;  %v1484_v30 = vpop.trf.xlu0 }
 0x33d   :  { %3135 = vmatmul.mubr.msk.f32.vlgmr.msra.gmra.mrb[12].mxu1 %vm1499_vm2, %v1484_v30  ;;  %3149 = vmatmul.mubr.msk.f32.vlgmr.msra.gmra.mrb[20].mxu0 %vm1499_vm2, %v1646_v29 }
 0x33e   :  { %3245 = vmatpush3.msra.mxu1 %v1460_v6  ;;  %3175 = vmatpush3.msra.mxu0 %v1462_v27 }
 0x33f   :  { %3160 = vmatprep.subr.mxu1 %v1461_v23  ;;  %3202 = vmatprep.subr.mxu0 %v1464_v62 }
 0x340   :  { %v1647_v31 = vpop.trf.xlu1  ;;  %v1485_v32 = vpop.trf.xlu0 }
 0x341   :  { %3137 = vmatprep.mubr.msk.f32.mxu1 %vm1499_vm2, %v1485_v32  ;;  %3151 = vmatprep.mubr.msk.f32.mxu0 %vm1499_vm2, %v1647_v31 }
 0x344   :  { %v1648_v33 = vpop.trf.xlu1  ;;  %v1486_v34 = vpop.trf.xlu0 }
 0x345   :  { %3138 = vmatmul.mubr.msk.f32.gmra.mrb[14].mxu1 %vm1499_vm2, %v1486_v34  ;;  %3152 = vmatmul.mubr.msk.f32.gmra.mrb[22].mxu0 %vm1499_vm2, %v1648_v33 }
 0x348   :  { %v1649_v35 = vpop.trf.xlu1  ;;  %v1487_v36 = vpop.trf.xlu0 }
 0x349   :  { %3140 = vmatprep.mubr.msk.f32.mxu1 %vm1499_vm2, %v1487_v36  ;;  %3154 = vmatprep.mubr.msk.f32.mxu0 %vm1499_vm2, %v1649_v35 }
 0x34c   :  { %v1650_v37 = vpop.trf.xlu1  ;;  %v1488_v38 = vpop.trf.xlu0 }
 0x34d   :  { %3141 = vmatmul.mubr.msk.f32.gmra.mrb[16].mxu1 %vm1499_vm2, %v1488_v38  ;;  %3155 = vmatmul.mubr.msk.f32.gmra.mrb[24].mxu0 %vm1499_vm2, %v1650_v37 }
 0x350   :  { %v1651_v40 = vpop.trf.xlu1  ;;  %v1489_v41 = vpop.trf.xlu0 }
 0x351   :  { %3143 = vmatprep.mubr.msk.f32.mxu1 %vm1499_vm2, %v1489_v41 }
 0x354   :  { %v1652_v42 = vpop.trf.xlu1  ;;  %v1490_v43 = vpop.trf.xlu0 }
 0x355   :  { %3144 = vmatmul.mubr.msk.f32.gmra.mrb[18].mxu1 %vm1499_vm2, %v1490_v43 }
 0x356   :  { %3157 = vmatprep.mubr.msk.f32.mxu1 %vm1499_vm2, %v1651_v40 }
 0x358   :  { %v1967_v44 = vpop.trf.xlu1  ;;  %v1806_v45 = vpop.trf.xlu0 }
 0x359   :  { %3158 = vmatmul.mubr.msk.f32.vlgmr.msra.gmra.mrb[20].mxu1 %vm1499_vm2, %v1652_v42  ;;  %3176 = vmatprep.mubr.msk.f32.mxu0 %vm1499_vm2, %v1967_v44 }
 0x35a   :  { %3161 = vmatpush3.msra.mxu1 %v1461_v23  ;;  %3162 = vmatprep.mubr.msk.f32.mxu1 %vm1499_vm2, %v1806_v45 }
 0x35b   :  { %3188 = vmatprep.subr.mxu1 %v1463_v24 }
 0x35c   :  { %v1968_v46 = vpop.trf.xlu1  ;;  %v1807_v47 = vpop.trf.xlu0 }
 0x35d   :  { %3163 = vmatmul.mubr.msk.f32.vlgmr.msra.gmra.mrb[22].mxu1 %vm1499_vm2, %v1807_v47  ;;  %3177 = vmatmul.mubr.msk.f32.vlgmr.msra.gmra.mrb[26].mxu0 %vm1499_vm2, %v1968_v46 }
 0x35e   :  { %3189 = vmatpush3.msra.mxu1 %v1463_v24  ;;  %3203 = vmatpush3.msra.mxu0 %v1464_v62 }
 0x35f   :  { %3216 = vmatprep.subr.mxu1 %v3801_v25  ;;  %3230 = vmatprep.subr.mxu0 %v3803_v26 }
 0x360   :  { %v1969_v63 = vpop.trf.xlu1  ;;  %v1808_v39 = vpop.trf.xlu0 }
 0x361   :  { %3165 = vmatprep.mubr.msk.f32.mxu1 %vm1499_vm2, %v1808_v39  ;;  %3179 = vmatprep.mubr.msk.f32.mxu0 %vm1499_vm2, %v1969_v63 }
 0x364   :  { %v1970_v2 = vpop.trf.xlu1  ;;  %v1809_v48 = vpop.trf.xlu0 }
 0x365   :  { %3166 = vmatmul.mubr.msk.f32.gmra.mrb[24].mxu1 %vm1499_vm2, %v1809_v48  ;;  %3180 = vmatmul.mubr.msk.f32.gmra.mrb[28].mxu0 %vm1499_vm2, %v1970_v2 }
 0x368   :  { %v1971_v49 = vpop.trf.xlu1  ;;  %v1810_v50 = vpop.trf.xlu0 }
 0x369   :  { %3168 = vmatprep.mubr.msk.f32.mxu1 %vm1499_vm2, %v1810_v50  ;;  %3182 = vmatprep.mubr.msk.f32.mxu0 %vm1499_vm2, %v1971_v49 }
 0x36c   :  { %v1972_v51 = vpop.trf.xlu1  ;;  %v1811_v52 = vpop.trf.xlu0 }
 0x36d   :  { %3169 = vmatmul.mubr.msk.f32.gmra.mrb[26].mxu1 %vm1499_vm2, %v1811_v52  ;;  %3183 = vmatmul.mubr.msk.f32.gmra.mrb[30].mxu0 %vm1499_vm2, %v1972_v51 }
 0x370   :  { %v1973_v54 = vpop.trf.xlu1  ;;  %v1812_v55 = vpop.trf.xlu0 }
 0x371   :  { %3171 = vmatprep.mubr.msk.f32.mxu1 %vm1499_vm2, %v1812_v55  ;;  %3185 = vmatprep.mubr.msk.f32.mxu0 %vm1499_vm2, %v1973_v54 }
 0x374   :  { %v1974_v56 = vpop.trf.xlu1  ;;  %v1813_v57 = vpop.trf.xlu0 }
 0x375   :  { %3172 = vmatmul.mubr.msk.f32.gmra.mrb[28].mxu1 %vm1499_vm2, %v1813_v57  ;;  %3186 = vmatmul.mubr.msk.f32.gmra.mrb[32].mxu0 %vm1499_vm2, %v1974_v56 }
 0x378   :  { %v2289_v59 = vpop.trf.xlu1  ;;  %v2128_v60 = vpop.trf.xlu0 }
 0x379   :  { %3190 = vmatprep.mubr.msk.f32.mxu1 %vm1499_vm2, %v2128_v60  ;;  %3204 = vmatprep.mubr.msk.f32.mxu0 %vm1499_vm2, %v2289_v59 }
 0x37c   :  { %v2290_v61 = vpop.trf.xlu1  ;;  %v2129_v1 = vpop.trf.xlu0 }
 0x37d   :  { %3191 = vmatmul.mubr.msk.f32.vlgmr.msra.gmra.mrb[30].mxu1 %vm1499_vm2, %v2129_v1  ;;  %3205 = vmatmul.mubr.msk.f32.vlgmr.msra.gmra.mrb[34].mxu0 %vm1499_vm2, %v2290_v61 }
 0x37e   :  { %3217 = vmatpush3.msra.mxu1 %v3801_v25  ;;  %3231 = vmatpush3.msra.mxu0 %v3803_v26 }
 0x380   :  { %v2291_v3 = vpop.trf.xlu1  ;;  %v2130_v53 = vpop.trf.xlu0 }
 0x381   :  { %3193 = vmatprep.mubr.msk.f32.mxu1 %vm1499_vm2, %v2130_v53  ;;  %3207 = vmatprep.mubr.msk.f32.mxu0 %vm1499_vm2, %v2291_v3 }
 0x384   :  { %v2292_v4 = vpop.trf.xlu1  ;;  %v2131_v5 = vpop.trf.xlu0 }
 0x385   :  { %3194 = vmatmul.mubr.msk.f32.gmra.mrb[32].mxu1 %vm1499_vm2, %v2131_v5  ;;  %3208 = vmatmul.mubr.msk.f32.gmra.mrb[36].mxu0 %vm1499_vm2, %v2292_v4 }
 0x388   :  { %v2293_v7 = vpop.trf.xlu1  ;;  %v2132_v8 = vpop.trf.xlu0 }
 0x389   :  { %3196 = vmatprep.mubr.msk.f32.mxu1 %vm1499_vm2, %v2132_v8  ;;  %3210 = vmatprep.mubr.msk.f32.mxu0 %vm1499_vm2, %v2293_v7 }
 0x38c   :  { %v2294_v9 = vpop.trf.xlu1  ;;  %v2133_v10 = vpop.trf.xlu0 }
 0x38d   :  { %3197 = vmatmul.mubr.msk.f32.gmra.mrb[34].mxu1 %vm1499_vm2, %v2133_v10  ;;  %3211 = vmatmul.mubr.msk.f32.gmra.mrb[38].mxu0 %vm1499_vm2, %v2294_v9 }
 0x390   :  { %v2295_v0 = vpop.trf.xlu1  ;;  %v2134_v11 = vpop.trf.xlu0 }
 0x391   :  { %3199 = vmatprep.mubr.msk.f32.mxu1 %vm1499_vm2, %v2134_v11  ;;  %3213 = vmatprep.mubr.msk.f32.mxu0 %vm1499_vm2, %v2295_v0 }
 0x394   :  { %v2296_v12 = vpop.trf.xlu1  ;;  %v2135_v58 = vpop.trf.xlu0 }
 0x395   :  { %3200 = vmatmul.mubr.msk.f32.gmra.mrb[36].mxu1 %vm1499_vm2, %v2135_v58  ;;  %3214 = vmatmul.mubr.msk.f32.gmra.mrb[40].mxu0 %vm1499_vm2, %v2296_v12 }
 0x398   :  { %v2611_v14 = vpop.trf.xlu1  ;;  %v2450_v15 = vpop.trf.xlu0 }
 0x399   :  { %3218 = vmatprep.mubr.msk.f32.mxu1 %vm1499_vm2, %v2450_v15  ;;  %3232 = vmatprep.mubr.msk.f32.mxu0 %vm1499_vm2, %v2611_v14 }
 0x39c   :  { %v2612_v16 = vpop.trf.xlu1  ;;  %v2451_v17 = vpop.trf.xlu0 }
 0x39d   :  { %3219 = vmatmul.mubr.msk.f32.vlgmr.msra.gmra.mrb[38].mxu1 %vm1499_vm2, %v2451_v17  ;;  %3233 = vmatmul.mubr.msk.f32.vlgmr.msra.gmra.mrb[42].mxu0 %vm1499_vm2, %v2612_v16 }
 0x3a0   :  { %v2613_v18 = vpop.trf.xlu1  ;;  %v2452_v19 = vpop.trf.xlu0 }
 0x3a1   :  { %3221 = vmatprep.mubr.msk.f32.mxu1 %vm1499_vm2, %v2452_v19  ;;  %3235 = vmatprep.mubr.msk.f32.mxu0 %vm1499_vm2, %v2613_v18 }
 0x3a4   :  { %v2614_v20 = vpop.trf.xlu1  ;;  %v2453_v21 = vpop.trf.xlu0 }
 0x3a5   :  { %3222 = vmatmul.mubr.msk.f32.gmra.mrb[40].mxu1 %vm1499_vm2, %v2453_v21  ;;  %3236 = vmatmul.mubr.msk.f32.gmra.mrb[44].mxu0 %vm1499_vm2, %v2614_v20 }
 0x3a8   :  { %v2615_v22 = vpop.trf.xlu1  ;;  %v2454_v6 = vpop.trf.xlu0 }
 0x3a9   :  { %3224 = vmatprep.mubr.msk.f32.mxu1 %vm1499_vm2, %v2454_v6  ;;  %3238 = vmatprep.mubr.msk.f32.mxu0 %vm1499_vm2, %v2615_v22 }
 0x3ac   :  { %v2616_v23 = vpop.trf.xlu1  ;;  %v2455_v62 = vpop.trf.xlu0 }
 0x3ad   :  { %3225 = vmatmul.mubr.msk.f32.gmra.mrb[42].mxu1 %vm1499_vm2, %v2455_v62  ;;  %3239 = vmatmul.mubr.msk.f32.gmra.mrb[46].mxu0 %vm1499_vm2, %v2616_v23 }
 0x3b0   :  { %v2617_v24 = vpop.trf.xlu1  ;;  %v2456_v25 = vpop.trf.xlu0 }
 0x3b1   :  { %3227 = vmatprep.mubr.msk.f32.mxu1 %vm1499_vm2, %v2456_v25  ;;  %3241 = vmatprep.mubr.msk.f32.mxu0 %vm1499_vm2, %v2617_v24 }
 0x3b4   :  { %v2618_v26 = vpop.trf.xlu1  ;;  %v2457_v27 = vpop.trf.xlu0 }
 0x3b5   :  { %3228 = vmatmul.mubr.msk.f32.gmra.mrb[44].mxu1 %vm1499_vm2, %v2457_v27  ;;  %3242 = vmatmul.mubr.msk.f32.gmra.mrb[48].mxu0 %vm1499_vm2, %v2618_v26 }
 0x3b6   :  { %3532 = shalt.err (!%p3529_p2)
}
 0x3b7   :  { %s3533_s29 = scalar_lea.hbm %s4147_s6, 512 }
 0x3b8   :  { %p3534_p3 = scmp.ne.s32.totalorder %s4147_s6, %s3533_s29  ;;  %p3537_p4 = scmp.lt.u32.totalorder %s3533_s29, %s4147_s6 }
 0x3ba   :  { %p3539_p5 = pnand %p3537_p4, %p3534_p3 }
 0x3bc   :  { %3542 = shalt.err (!%p3539_p5)
}
 0x3bd   :  { %2833 = dma.vmem_to_hbm [thread:$0]  %s2831_s24, 512, %s4147_s6, [#allocation4]  }
 0x410   :  { %v3136_v13 = vpop.f32.mrb[12].mxu1  ;;  %v3150_v28 = vpop.f32.mrb[20].mxu0 }
 0x411   :  { %2757 = vst.msk [vmem:[%s4148_s7 + $0x8] sm:$0xff] %vm151_vm1, %v3136_v13  ;;  %2765 = vst.msk [vmem:[%s4148_s7 + $0x48] sm:$0xff] %vm151_vm1, %v3150_v28  ;;  %v1590_v29 = vpop.f32.mrb[13].mxu1  ;;  %v1751_v30 = vpop.f32.mrb[21].mxu0 }
 0x412   :  { %2756 = vst.msk [vmem:[%s4148_s7] sm:$0xff] %vm151_vm1, %v1590_v29  ;;  %2764 = vst.msk [vmem:[%s4148_s7 + $0x40] sm:$0xff] %vm151_vm1, %v1751_v30 }
 0x418   :  { %v3139_v31 = vpop.f32.mrb[14].mxu1  ;;  %v3153_v32 = vpop.f32.mrb[22].mxu0 }
 0x419   :  { %2759 = vst.msk [vmem:[%s4148_s7 + $0x18] sm:$0xff] %vm151_vm1, %v3139_v31  ;;  %2767 = vst.msk [vmem:[%s4148_s7 + $0x58] sm:$0xff] %vm151_vm1, %v3153_v32  ;;  %v1600_v33 = vpop.f32.mrb[15].mxu1  ;;  %v1761_v34 = vpop.f32.mrb[23].mxu0 }
 0x41a   :  { %2758 = vst.msk [vmem:[%s4148_s7 + $0x10] sm:$0xff] %vm151_vm1, %v1600_v33  ;;  %2766 = vst.msk [vmem:[%s4148_s7 + $0x50] sm:$0xff] %vm151_vm1, %v1761_v34 }
 0x420   :  { %v3142_v35 = vpop.f32.mrb[16].mxu1  ;;  %v3156_v36 = vpop.f32.mrb[24].mxu0 }
 0x421   :  { %2761 = vst.msk [vmem:[%s4148_s7 + $0x28] sm:$0xff] %vm151_vm1, %v3142_v35  ;;  %2769 = vst.msk [vmem:[%s4148_s7 + $0x68] sm:$0xff] %vm151_vm1, %v3156_v36  ;;  %v1610_v37 = vpop.f32.mrb[17].mxu1  ;;  %v1771_v38 = vpop.f32.mrb[25].mxu0 }
 0x422   :  { %2760 = vst.msk [vmem:[%s4148_s7 + $0x20] sm:$0xff] %vm151_vm1, %v1610_v37  ;;  %2768 = vst.msk [vmem:[%s4148_s7 + $0x60] sm:$0xff] %vm151_vm1, %v1771_v38 }
 0x428   :  { %v3145_v40 = vpop.f32.mrb[18].mxu1 }
 0x429   :  { %2763 = vst.msk [vmem:[%s4148_s7 + $0x38] sm:$0xff] %vm151_vm1, %v3145_v40  ;;  %v1620_v41 = vpop.f32.mrb[19].mxu1 }
 0x42a   :  { %2762 = vst.msk [vmem:[%s4148_s7 + $0x30] sm:$0xff] %vm151_vm1, %v1620_v41 }
 0x42c   :  { %v3159_v42 = vpop.f32.mrb[20].mxu1 }
 0x42d   :  { %2771 = vst.msk [vmem:[%s4148_s7 + $0x78] sm:$0xff] %vm151_vm1, %v3159_v42  ;;  %v1781_v43 = vpop.f32.mrb[21].mxu1 }
 0x42e   :  { %2770 = vst.msk [vmem:[%s4148_s7 + $0x70] sm:$0xff] %vm151_vm1, %v1781_v43 }
 0x430   :  { %v3164_v44 = vpop.f32.mrb[22].mxu1  ;;  %v3178_v45 = vpop.f32.mrb[26].mxu0 }
 0x431   :  { %2773 = vst.msk [vmem:[%s4148_s7 + $0x88] sm:$0xff] %vm151_vm1, %v3164_v44  ;;  %2781 = vst.msk [vmem:[%s4148_s7 + $0xc8] sm:$0xff] %vm151_vm1, %v3178_v45  ;;  %v1912_v46 = vpop.f32.mrb[23].mxu1  ;;  %v2073_v47 = vpop.f32.mrb[27].mxu0 }
 0x432   :  { %2772 = vst.msk [vmem:[%s4148_s7 + $0x80] sm:$0xff] %vm151_vm1, %v1912_v46  ;;  %2780 = vst.msk [vmem:[%s4148_s7 + $0xc0] sm:$0xff] %vm151_vm1, %v2073_v47 }
 0x438   :  { %v3167_v63 = vpop.f32.mrb[24].mxu1  ;;  %v3181_v39 = vpop.f32.mrb[28].mxu0 }
 0x439   :  { %2775 = vst.msk [vmem:[%s4148_s7 + $0x98] sm:$0xff] %vm151_vm1, %v3167_v63  ;;  %2783 = vst.msk [vmem:[%s4148_s7 + $0xd8] sm:$0xff] %vm151_vm1, %v3181_v39  ;;  %v1922_v2 = vpop.f32.mrb[25].mxu1  ;;  %v2083_v48 = vpop.f32.mrb[29].mxu0 }
 0x43a   :  { %2774 = vst.msk [vmem:[%s4148_s7 + $0x90] sm:$0xff] %vm151_vm1, %v1922_v2  ;;  %2782 = vst.msk [vmem:[%s4148_s7 + $0xd0] sm:$0xff] %vm151_vm1, %v2083_v48 }
 0x440   :  { %v3170_v49 = vpop.f32.mrb[26].mxu1  ;;  %v3184_v50 = vpop.f32.mrb[30].mxu0 }
 0x441   :  { %2777 = vst.msk [vmem:[%s4148_s7 + $0xa8] sm:$0xff] %vm151_vm1, %v3170_v49  ;;  %2785 = vst.msk [vmem:[%s4148_s7 + $0xe8] sm:$0xff] %vm151_vm1, %v3184_v50  ;;  %v1932_v51 = vpop.f32.mrb[27].mxu1  ;;  %v2093_v52 = vpop.f32.mrb[31].mxu0 }
 0x442   :  { %2776 = vst.msk [vmem:[%s4148_s7 + $0xa0] sm:$0xff] %vm151_vm1, %v1932_v51  ;;  %2784 = vst.msk [vmem:[%s4148_s7 + $0xe0] sm:$0xff] %vm151_vm1, %v2093_v52 }
 0x448   :  { %v3173_v54 = vpop.f32.mrb[28].mxu1  ;;  %v3187_v55 = vpop.f32.mrb[32].mxu0 }
 0x449   :  { %2779 = vst.msk [vmem:[%s4148_s7 + $0xb8] sm:$0xff] %vm151_vm1, %v3173_v54  ;;  %2787 = vst.msk [vmem:[%s4148_s7 + $0xf8] sm:$0xff] %vm151_vm1, %v3187_v55  ;;  %v1942_v56 = vpop.f32.mrb[29].mxu1  ;;  %v2103_v57 = vpop.f32.mrb[33].mxu0 }
 0x44a   :  { %2778 = vst.msk [vmem:[%s4148_s7 + $0xb0] sm:$0xff] %vm151_vm1, %v1942_v56  ;;  %2786 = vst.msk [vmem:[%s4148_s7 + $0xf0] sm:$0xff] %vm151_vm1, %v2103_v57 }
 0x450   :  { %v3192_v59 = vpop.f32.mrb[30].mxu1  ;;  %v3206_v60 = vpop.f32.mrb[34].mxu0 }
 0x451   :  { %2789 = vst.msk [vmem:[%s4148_s7 + $0x108] sm:$0xff] %vm151_vm1, %v3192_v59  ;;  %2797 = vst.msk [vmem:[%s4148_s7 + $0x148] sm:$0xff] %vm151_vm1, %v3206_v60  ;;  %v2234_v61 = vpop.f32.mrb[31].mxu1  ;;  %v2395_v1 = vpop.f32.mrb[35].mxu0 }
 0x452   :  { %2788 = vst.msk [vmem:[%s4148_s7 + $0x100] sm:$0xff] %vm151_vm1, %v2234_v61  ;;  %2796 = vst.msk [vmem:[%s4148_s7 + $0x140] sm:$0xff] %vm151_vm1, %v2395_v1 }
 0x458   :  { %v3195_v3 = vpop.f32.mrb[32].mxu1  ;;  %v3209_v53 = vpop.f32.mrb[36].mxu0 }
 0x459   :  { %2791 = vst.msk [vmem:[%s4148_s7 + $0x118] sm:$0xff] %vm151_vm1, %v3195_v3  ;;  %2799 = vst.msk [vmem:[%s4148_s7 + $0x158] sm:$0xff] %vm151_vm1, %v3209_v53  ;;  %v2244_v4 = vpop.f32.mrb[33].mxu1  ;;  %v2405_v5 = vpop.f32.mrb[37].mxu0 }
 0x45a   :  { %2790 = vst.msk [vmem:[%s4148_s7 + $0x110] sm:$0xff] %vm151_vm1, %v2244_v4  ;;  %2798 = vst.msk [vmem:[%s4148_s7 + $0x150] sm:$0xff] %vm151_vm1, %v2405_v5 }
 0x460   :  { %v3198_v7 = vpop.f32.mrb[34].mxu1  ;;  %v3212_v8 = vpop.f32.mrb[38].mxu0 }
 0x461   :  { %2793 = vst.msk [vmem:[%s4148_s7 + $0x128] sm:$0xff] %vm151_vm1, %v3198_v7  ;;  %2801 = vst.msk [vmem:[%s4148_s7 + $0x168] sm:$0xff] %vm151_vm1, %v3212_v8  ;;  %v2254_v9 = vpop.f32.mrb[35].mxu1  ;;  %v2415_v10 = vpop.f32.mrb[39].mxu0 }
 0x462   :  { %2792 = vst.msk [vmem:[%s4148_s7 + $0x120] sm:$0xff] %vm151_vm1, %v2254_v9  ;;  %2800 = vst.msk [vmem:[%s4148_s7 + $0x160] sm:$0xff] %vm151_vm1, %v2415_v10 }
 0x468   :  { %v3201_v0 = vpop.f32.mrb[36].mxu1  ;;  %v3215_v11 = vpop.f32.mrb[40].mxu0 }
 0x469   :  { %2795 = vst.msk [vmem:[%s4148_s7 + $0x138] sm:$0xff] %vm151_vm1, %v3201_v0  ;;  %2803 = vst.msk [vmem:[%s4148_s7 + $0x178] sm:$0xff] %vm151_vm1, %v3215_v11  ;;  %v2264_v12 = vpop.f32.mrb[37].mxu1  ;;  %v2425_v58 = vpop.f32.mrb[41].mxu0 }
 0x46a   :  { %2794 = vst.msk [vmem:[%s4148_s7 + $0x130] sm:$0xff] %vm151_vm1, %v2264_v12  ;;  %2802 = vst.msk [vmem:[%s4148_s7 + $0x170] sm:$0xff] %vm151_vm1, %v2425_v58 }
 0x470   :  { %v3220_v14 = vpop.f32.mrb[38].mxu1  ;;  %v3234_v15 = vpop.f32.mrb[42].mxu0 }
 0x471   :  { %2805 = vst.msk [vmem:[%s4148_s7 + $0x188] sm:$0xff] %vm151_vm1, %v3220_v14  ;;  %2813 = vst.msk [vmem:[%s4148_s7 + $0x1c8] sm:$0xff] %vm151_vm1, %v3234_v15  ;;  %v2556_v16 = vpop.f32.mrb[39].mxu1  ;;  %v2717_v17 = vpop.f32.mrb[43].mxu0 }
 0x472   :  { %2804 = vst.msk [vmem:[%s4148_s7 + $0x180] sm:$0xff] %vm151_vm1, %v2556_v16  ;;  %2812 = vst.msk [vmem:[%s4148_s7 + $0x1c0] sm:$0xff] %vm151_vm1, %v2717_v17 }
 0x478   :  { %v3223_v18 = vpop.f32.mrb[40].mxu1  ;;  %v3237_v19 = vpop.f32.mrb[44].mxu0 }
 0x479   :  { %2807 = vst.msk [vmem:[%s4148_s7 + $0x198] sm:$0xff] %vm151_vm1, %v3223_v18  ;;  %2815 = vst.msk [vmem:[%s4148_s7 + $0x1d8] sm:$0xff] %vm151_vm1, %v3237_v19  ;;  %v2566_v20 = vpop.f32.mrb[41].mxu1  ;;  %v2727_v21 = vpop.f32.mrb[45].mxu0 }
 0x47a   :  { %2806 = vst.msk [vmem:[%s4148_s7 + $0x190] sm:$0xff] %vm151_vm1, %v2566_v20  ;;  %2814 = vst.msk [vmem:[%s4148_s7 + $0x1d0] sm:$0xff] %vm151_vm1, %v2727_v21 }
 0x480   :  { %v3226_v22 = vpop.f32.mrb[42].mxu1  ;;  %v3240_v6 = vpop.f32.mrb[46].mxu0 }
 0x481   :  { %2809 = vst.msk [vmem:[%s4148_s7 + $0x1a8] sm:$0xff] %vm151_vm1, %v3226_v22  ;;  %2817 = vst.msk [vmem:[%s4148_s7 + $0x1e8] sm:$0xff] %vm151_vm1, %v3240_v6  ;;  %v2576_v23 = vpop.f32.mrb[43].mxu1  ;;  %v2737_v62 = vpop.f32.mrb[47].mxu0 }
 0x482   :  { %2808 = vst.msk [vmem:[%s4148_s7 + $0x1a0] sm:$0xff] %vm151_vm1, %v2576_v23  ;;  %2816 = vst.msk [vmem:[%s4148_s7 + $0x1e0] sm:$0xff] %vm151_vm1, %v2737_v62 }
 0x488   :  { %v3229_v24 = vpop.f32.mrb[44].mxu1  ;;  %v3243_v25 = vpop.f32.mrb[48].mxu0 }
 0x489   :  { %2811 = vst.msk [vmem:[%s4148_s7 + $0x1b8] sm:$0xff] %vm151_vm1, %v3229_v24  ;;  %2819 = vst.msk [vmem:[%s4148_s7 + $0x1f8] sm:$0xff] %vm151_vm1, %v3243_v25  ;;  %v2586_v26 = vpop.f32.mrb[45].mxu1  ;;  %v2747_v27 = vpop.f32.mrb[49].mxu0 }
 0x48a   :  { %2810 = vst.msk [vmem:[%s4148_s7 + $0x1b0] sm:$0xff] %vm151_vm1, %v2586_v26  ;;  %2818 = vst.msk [vmem:[%s4148_s7 + $0x1f0] sm:$0xff] %vm151_vm1, %v2747_v27 }
 0x48b   :  { %3549 = dma.done.wait [#allocation4], 512  }
 0x48c   :  { %3550 = vsyncadd [#allocation4], 4294966784 }
 0x48d   :  { %2841 = vsyncpa [#allocation3], 1 }
 0x48e   :  { %2842 = vsyncpa [#allocation6], 1 }
 0x48f   :  { %2843 = vsyncpa [#allocation9], 1 }
 0x490   :  { %2844 = vsyncpa [#allocation4], 1 }

</bundles_post_ra>
